<compile_context>
chip_gen: v6e
topology: v6e:2x2x1
jax: 0.10.0
libtpu: 0.0.40
codegen_flags: <defaults>
</compile_context>

<pallas_src>
import math

import jax
import jax.numpy as jnp
from jax.experimental import pallas as pl
from jax.experimental.pallas import tpu as pltpu

# ----- small synthetic DistilBERT config -----
VOCAB = 100        # vocab size
MAX_POS = 16       # max position embeddings
B, S = 2, 8        # batch, sequence length
H = 32             # hidden size
NH, HD = 4, 8      # heads, head dim (NH * HD == H)
FF = 64            # FFN intermediate size
NL = 2             # number of transformer layers
NUM_LABELS = 3
LOGIT_PAD = 128    # lane-dense padded width of the classifier output
LN_EPS = 1e-12

assert NH * HD == H


# ----------------- shared math helpers (pure jnp, usable in & out of kernel) -----------------
def _layernorm(x, g, b):
    mu = jnp.mean(x, axis=-1, keepdims=True)
    var = jnp.mean(jnp.square(x - mu), axis=-1, keepdims=True)
    return (x - mu) * jax.lax.rsqrt(var + LN_EPS) * g + b


def _gelu(x):
    # TODO(synk): DistilBERT uses exact erf-GELU; tanh approximation used here
    # (the pure-JAX reference uses the same formula, so validation is exact-to-exact).
    c = math.sqrt(2.0 / math.pi)
    return 0.5 * x * (1.0 + jnp.tanh(c * (x + 0.044715 * x * x * x)))


# ----------------- fused Pallas kernel -----------------
def fused_forward_kernel(
        x_emb_ref, neg_ref, emb_g_ref, emb_b_ref,
        wqkv_ref, bqkv_ref, wo_ref, bo_ref,
        g1_ref, be1_ref, w1_ref, b1_ref, w2_ref, b2_ref, g2_ref, be2_ref,
        wp_ref, bp_ref, wc_ref, bc_ref,
        logits_ref, x_scr):
    """One grid step == one transformer layer.

    x_scr : persistent VMEM scratch (B*S, H) holding the running activation.
    Grid step 0 additionally runs the embedding LayerNorm; the last grid step
    additionally runs the [CLS] pooling + pre_classifier + classifier head.
    """
    layer = pl.program_id(0)

    # --- embedding LayerNorm (only once, before the first layer) ---
    @pl.when(layer == 0)
    def _():
        x_scr[...] = _layernorm(x_emb_ref[...], emb_g_ref[...], emb_b_ref[...])

    x = x_scr[...]                                            # (B*S, H)

    # --- multi-head self-attention (fused QKV projection) ---
    qkv = jnp.dot(x, wqkv_ref[...],
                  preferred_element_type=jnp.float32) + bqkv_ref[...]   # (B*S, 3H)
    qkv3 = qkv.reshape(B, S, 3 * H)
    neg = neg_ref[...]                                        # (B, 1, S) additive mask
    inv_sqrt_d = 1.0 / math.sqrt(HD)

    # Heads unrolled (NH=4) but batched over B with 3-D einsums; per-head
    # contexts stay in registers and are concatenated once -> no VMEM
    # scratch writes of narrow column slices.
    head_ctx = []
    for h in range(NH):
        q_h = qkv3[:, :, h * HD:(h + 1) * HD] * inv_sqrt_d
        k_h = qkv3[:, :, H + h * HD:H + (h + 1) * HD]
        v_h = qkv3[:, :, 2 * H + h * HD:2 * H + (h + 1) * HD]
        s = jnp.einsum('bqd,bkd->bqk', q_h, k_h,
                       preferred_element_type=jnp.float32)    # (B, S, S)
        s = s + neg
        s = s - jnp.max(s, axis=-1, keepdims=True)
        p = jnp.exp(s)
        p = p * pl.reciprocal(jnp.sum(p, axis=-1, keepdims=True), approx=True)
        head_ctx.append(jnp.einsum('bqk,bkd->bqd', p, v_h,
                                   preferred_element_type=jnp.float32))
    ctx = jnp.concatenate(head_ctx, axis=-1).reshape(B * S, H)

    attn_out = jnp.dot(ctx, wo_ref[...],
                       preferred_element_type=jnp.float32) + bo_ref[...]
    h1 = _layernorm(x + attn_out, g1_ref[...], be1_ref[...])

    # --- feed-forward ---
    f = jnp.dot(h1, w1_ref[...], preferred_element_type=jnp.float32) + b1_ref[...]
    f = _gelu(f)
    f = jnp.dot(f, w2_ref[...], preferred_element_type=jnp.float32) + b2_ref[...]
    x_new = _layernorm(h1 + f, g2_ref[...], be2_ref[...])
    x_scr[...] = x_new

    # --- classifier head (only after the last layer) ---
    @pl.when(layer == pl.num_programs(0) - 1)
    def _():
        cls = x_new.reshape(B, S, H)[:, 0, :]                 # (B, H) [CLS] rows
        pre = jnp.dot(cls, wp_ref[...],
                      preferred_element_type=jnp.float32) + bp_ref[...]
        pre = jnp.maximum(pre, 0.0)                           # ReLU
        logits_ref[...] = jnp.dot(pre, wc_ref[...],
                                  preferred_element_type=jnp.float32) + bc_ref[...]


# ----------------- pallas_call plumbing -----------------
def _full_spec(shape):
    nd = len(shape)
    return pl.BlockSpec(shape, lambda l, _nd=nd: (0,) * _nd)


def _layer_spec(shape):
    # shape = (NL, ...): stream one layer's slice per grid step, squeeze NL dim.
    nd = len(shape)
    return pl.BlockSpec((None,) + tuple(shape[1:]),
                        lambda l, _n=nd - 1: (l,) + (0,) * _n)


def run_fused_forward(x_emb, neg_mask, emb_g, emb_b, stacked, wp, bp, wc_pad, bc_pad):
    head = (x_emb, neg_mask, emb_g, emb_b)
    tail = (wp, bp, wc_pad, bc_pad)
    in_specs = ([_full_spec(a.shape) for a in head]
                + [_layer_spec(a.shape) for a in stacked]
                + [_full_spec(a.shape) for a in tail])
    return pl.pallas_call(
        fused_forward_kernel,
        out_shape=jax.ShapeDtypeStruct((B, LOGIT_PAD), jnp.float32),
        grid_spec=pltpu.PrefetchScalarGridSpec(
            num_scalar_prefetch=0,
            grid=(NL,),
            in_specs=in_specs,
            out_specs=_full_spec((B, LOGIT_PAD)),
            scratch_shapes=[pltpu.VMEM((B * S, H), jnp.float32)]),
        compiler_params=pltpu.CompilerParams(
            dimension_semantics=("arbitrary",)),
    )(*head, *stacked, *tail)


# ----------------- parameters (deterministic synthetic init) -----------------
def init_params(key):
    keys = iter(jax.random.split(key, 64))  # more than enough keys

    def dense(din, dout):
        w = jax.random.normal(next(keys), (din, dout), jnp.float32) * 0.02
        b = jax.random.normal(next(keys), (1, dout), jnp.float32) * 0.02
        return w, b

    word_emb = jax.random.normal(next(keys), (VOCAB, H), jnp.float32) * 0.02
    pos_emb = jax.random.normal(next(keys), (MAX_POS, H), jnp.float32) * 0.02
    emb_g = jnp.ones((1, H), jnp.float32)
    emb_b = jnp.zeros((1, H), jnp.float32)

    layers = []
    for _ in range(NL):
        wq, bq = dense(H, H)
        wk, bk = dense(H, H)
        wv, bv = dense(H, H)
        wqkv = jnp.concatenate([wq, wk, wv], axis=1)          # (H, 3H) fused QKV
        bqkv = jnp.concatenate([bq, bk, bv], axis=1)          # (1, 3H)
        wo, bo = dense(H, H)
        g1 = jnp.ones((1, H), jnp.float32)
        be1 = jnp.zeros((1, H), jnp.float32)
        w1, b1 = dense(H, FF)
        w2, b2 = dense(FF, H)
        g2 = jnp.ones((1, H), jnp.float32)
        be2 = jnp.zeros((1, H), jnp.float32)
        layers.append((wqkv, bqkv, wo, bo, g1, be1, w1, b1, w2, b2, g2, be2))

    # stack per-layer params along a leading NL axis for the fused grid
    stacked = tuple(jnp.stack([lp[i] for lp in layers], axis=0)
                    for i in range(len(layers[0])))

    wp, bp = dense(H, H)                 # pre_classifier
    wc, bc = dense(H, NUM_LABELS)        # classifier
    # lane-dense padded classifier weights -> lane-dense (B, 128) output slab
    wc_pad = jnp.zeros((H, LOGIT_PAD), jnp.float32).at[:, :NUM_LABELS].set(wc)
    bc_pad = jnp.zeros((1, LOGIT_PAD), jnp.float32).at[:, :NUM_LABELS].set(bc)

    return dict(word_emb=word_emb, pos_emb=pos_emb, emb_g=emb_g, emb_b=emb_b,
                stacked=stacked, wp=wp, bp=bp,
                wc=wc, bc=bc, wc_pad=wc_pad, bc_pad=bc_pad)


# ----------------- full forward (RAGGenerator.forward) -----------------
def rag_generator_forward(input_ids, attention_mask, params):
    # embeddings (gather is glue, done in plain JAX)
    x = params["word_emb"][input_ids] + params["pos_emb"][:S][None, :, :]  # (B,S,H)
    x = x.reshape(B * S, H).astype(jnp.float32)
    # additive key mask: 0 where attended, -1e30 where padded
    neg = (1.0 - attention_mask.astype(jnp.float32))[:, None, :] * -1e30   # (B,1,S)

    logits_pad = run_fused_forward(
        x, neg, params["emb_g"], params["emb_b"], params["stacked"],
        params["wp"], params["bp"], params["wc_pad"], params["bc_pad"])
    return logits_pad[:, :NUM_LABELS]


# ----------------- pure-JAX reference (same math, for validation) -----------------
def reference_forward(input_ids, attention_mask, params):
    x = params["word_emb"][input_ids] + params["pos_emb"][:S][None, :, :]
    x = x.reshape(B * S, H).astype(jnp.float32)
    x = _layernorm(x, params["emb_g"], params["emb_b"])
    neg = (1.0 - attention_mask.astype(jnp.float32))[:, None, :] * -1e30
    for li in range(NL):
        (wqkv, bqkv, wo, bo,
         g1, be1, w1, b1, w2, b2, g2, be2) = (a[li] for a in params["stacked"])
        qkv = x @ wqkv + bqkv
        q, k, v = qkv[:, :H], qkv[:, H:2 * H], qkv[:, 2 * H:]
        q3 = q.reshape(B, S, H) * (1.0 / math.sqrt(HD))
        k3 = k.reshape(B, S, H)
        v3 = v.reshape(B, S, H)
        heads = []
        for h in range(NH):
            sl = slice(h * HD, (h + 1) * HD)
            s = jnp.einsum('bqd,bkd->bqk', q3[:, :, sl], k3[:, :, sl]) + neg
            s = s - jnp.max(s, axis=-1, keepdims=True)
            p = jnp.exp(s)
            p = p / jnp.sum(p, axis=-1, keepdims=True)
            heads.append(jnp.einsum('bqk,bkd->bqd', p, v3[:, :, sl]))
        ctx = jnp.concatenate(heads, axis=-1).reshape(B * S, H)
        h1 = _layernorm(x + ctx @ wo + bo, g1, be1)
        f = _gelu(h1 @ w1 + b1)
        x = _layernorm(h1 + f @ w2 + b2, g2, be2)
    cls = x.reshape(B, S, H)[:, 0, :]
    pre = jnp.maximum(cls @ params["wp"] + params["bp"], 0.0)
    return pre @ params["wc"] + params["bc"]


if __name__ == "__main__":
    key = jax.random.PRNGKey(0)
    pkey, dkey = jax.random.split(key)

    params = init_params(pkey)
    input_ids = jax.random.randint(dkey, (B, S), 0, VOCAB, dtype=jnp.int32)
    attention_mask = jnp.array(
        [[1, 1, 1, 1, 1, 1, 1, 1],
         [1, 1, 1, 1, 1, 1, 0, 0]], dtype=jnp.int32)

    logits = rag_generator_forward(input_ids, attention_mask, params)
    jax.block_until_ready(logits)

    assert logits.shape == (B, NUM_LABELS) and logits.dtype == jnp.float32
    assert bool(jnp.all(jnp.isfinite(logits)))

    ref = reference_forward(input_ids, attention_mask, params)
    max_diff = float(jnp.max(jnp.abs(logits - ref)))
    assert bool(jnp.allclose(logits, ref, atol=5e-3, rtol=5e-3)), \
        f"kernel vs reference mismatch, max abs diff = {max_diff}"

    print("KERNEL_OK")
</pallas_src>

<mosaic_0001>
module attributes {stable_mosaic.version = 11 : i64} {
  func.func @fused_forward_kernel(%arg0: i32, %arg1: memref<16x32xf32, #tpu.memory_space<vmem>>, %arg2: memref<2x1x8xf32, #tpu.memory_space<vmem>>, %arg3: memref<1x32xf32, #tpu.memory_space<vmem>>, %arg4: memref<1x32xf32, #tpu.memory_space<vmem>>, %arg5: memref<1x32x96xf32, #tpu.memory_space<vmem>>, %arg6: memref<1x1x96xf32, #tpu.memory_space<vmem>>, %arg7: memref<1x32x32xf32, #tpu.memory_space<vmem>>, %arg8: memref<1x1x32xf32, #tpu.memory_space<vmem>>, %arg9: memref<1x1x32xf32, #tpu.memory_space<vmem>>, %arg10: memref<1x1x32xf32, #tpu.memory_space<vmem>>, %arg11: memref<1x32x64xf32, #tpu.memory_space<vmem>>, %arg12: memref<1x1x64xf32, #tpu.memory_space<vmem>>, %arg13: memref<1x64x32xf32, #tpu.memory_space<vmem>>, %arg14: memref<1x1x32xf32, #tpu.memory_space<vmem>>, %arg15: memref<1x1x32xf32, #tpu.memory_space<vmem>>, %arg16: memref<1x1x32xf32, #tpu.memory_space<vmem>>, %arg17: memref<32x32xf32, #tpu.memory_space<vmem>>, %arg18: memref<1x32xf32, #tpu.memory_space<vmem>>, %arg19: memref<32x128xf32, #tpu.memory_space<vmem>>, %arg20: memref<1x128xf32, #tpu.memory_space<vmem>>, %arg21: memref<2x128xf32, #tpu.memory_space<vmem>>, %arg22: memref<16x32xf32, #tpu.memory_space<vmem>>) attributes {dimension_semantics = [#tpu.dimension_semantics<arbitrary>], iteration_bounds = array<i64: 2>, scalar_prefetch = 0 : i64, scratch_operands = 1 : i64, tpu.core_type = #tpu.core_type<tc>, window_params = [{pipeline_mode = #tpu.pipeline_mode<synchronous>, transform_indices = @transform_0, window_bounds = array<i64: 16, 32>}, {pipeline_mode = #tpu.pipeline_mode<synchronous>, transform_indices = @transform_1, window_bounds = array<i64: 2, 1, 8>}, {pipeline_mode = #tpu.pipeline_mode<synchronous>, transform_indices = @transform_2, window_bounds = array<i64: 1, 32>}, {pipeline_mode = #tpu.pipeline_mode<synchronous>, transform_indices = @transform_3, window_bounds = array<i64: 1, 32>}, {transform_indices = @transform_4, window_bounds = array<i64: 1, 32, 96>}, {transform_indices = @transform_5, window_bounds = array<i64: 1, 1, 96>}, {transform_indices = @transform_6, window_bounds = array<i64: 1, 32, 32>}, {transform_indices = @transform_7, window_bounds = array<i64: 1, 1, 32>}, {transform_indices = @transform_8, window_bounds = array<i64: 1, 1, 32>}, {transform_indices = @transform_9, window_bounds = array<i64: 1, 1, 32>}, {transform_indices = @transform_10, window_bounds = array<i64: 1, 32, 64>}, {transform_indices = @transform_11, window_bounds = array<i64: 1, 1, 64>}, {transform_indices = @transform_12, window_bounds = array<i64: 1, 64, 32>}, {transform_indices = @transform_13, window_bounds = array<i64: 1, 1, 32>}, {transform_indices = @transform_14, window_bounds = array<i64: 1, 1, 32>}, {transform_indices = @transform_15, window_bounds = array<i64: 1, 1, 32>}, {pipeline_mode = #tpu.pipeline_mode<synchronous>, transform_indices = @transform_16, window_bounds = array<i64: 32, 32>}, {pipeline_mode = #tpu.pipeline_mode<synchronous>, transform_indices = @transform_17, window_bounds = array<i64: 1, 32>}, {pipeline_mode = #tpu.pipeline_mode<synchronous>, transform_indices = @transform_18, window_bounds = array<i64: 32, 128>}, {pipeline_mode = #tpu.pipeline_mode<synchronous>, transform_indices = @transform_19, window_bounds = array<i64: 1, 128>}, {pipeline_mode = #tpu.pipeline_mode<synchronous>, transform_indices = @transform_20, window_bounds = array<i64: 2, 128>}]} {
    %c0_i32 = arith.constant 0 : i32
    %0 = arith.cmpi eq, %arg0, %c0_i32 : i32
    %1 = arith.extui %0 : i1 to i32
    %c0_i32_0 = arith.constant 0 : i32
    %2 = arith.cmpi ne, %1, %c0_i32_0 : i32
    scf.if %2 {
      %c0_81 = arith.constant 0 : index
      %c0_82 = arith.constant 0 : index
      %183 = vector.load %arg1[%c0_81, %c0_82] : memref<16x32xf32, #tpu.memory_space<vmem>>, vector<16x32xf32>
      %c0_83 = arith.constant 0 : index
      %c0_84 = arith.constant 0 : index
      %184 = vector.load %arg3[%c0_83, %c0_84] : memref<1x32xf32, #tpu.memory_space<vmem>>, vector<1x32xf32>
      %c0_85 = arith.constant 0 : index
      %c0_86 = arith.constant 0 : index
      %185 = vector.load %arg4[%c0_85, %c0_86] : memref<1x32xf32, #tpu.memory_space<vmem>>, vector<1x32xf32>
      %cst_87 = arith.constant dense<0.000000e+00> : vector<16xf32>
      %186 = vector.multi_reduction <add>, %183, %cst_87 [1] : vector<16x32xf32> to vector<16xf32>
      %187 = vector.shape_cast %186 : vector<16xf32> to vector<16x1xf32>
      %cst_88 = arith.constant 3.200000e+01 : f32
      %188 = vector.broadcast %cst_88 : f32 to vector<16x1xf32>
      %189 = arith.divf %187, %188 : vector<16x1xf32>
      %190 = vector.broadcast %189 : vector<16x1xf32> to vector<16x32xf32>
      %191 = arith.subf %183, %190 : vector<16x32xf32>
      %192 = arith.mulf %191, %191 : vector<16x32xf32>
      %cst_89 = arith.constant dense<0.000000e+00> : vector<16xf32>
      %193 = vector.multi_reduction <add>, %192, %cst_89 [1] : vector<16x32xf32> to vector<16xf32>
      %194 = vector.shape_cast %193 : vector<16xf32> to vector<16x1xf32>
      %cst_90 = arith.constant 3.200000e+01 : f32
      %195 = vector.broadcast %cst_90 : f32 to vector<16x1xf32>
      %196 = arith.divf %194, %195 : vector<16x1xf32>
      %197 = vector.broadcast %189 : vector<16x1xf32> to vector<16x32xf32>
      %198 = arith.subf %183, %197 : vector<16x32xf32>
      %cst_91 = arith.constant 9.99999996E-13 : f32
      %199 = vector.broadcast %cst_91 : f32 to vector<16x1xf32>
      %200 = arith.addf %196, %199 : vector<16x1xf32>
      %201 = math.rsqrt %200 : vector<16x1xf32>
      %202 = vector.broadcast %201 : vector<16x1xf32> to vector<16x32xf32>
      %203 = arith.mulf %198, %202 : vector<16x32xf32>
      %204 = vector.broadcast %184 : vector<1x32xf32> to vector<16x32xf32>
      %205 = arith.mulf %203, %204 : vector<16x32xf32>
      %206 = vector.broadcast %185 : vector<1x32xf32> to vector<16x32xf32>
      %207 = arith.addf %205, %206 : vector<16x32xf32>
      %c0_92 = arith.constant 0 : index
      %c0_93 = arith.constant 0 : index
      %208 = vector.load %arg22[%c0_92, %c0_93] : memref<16x32xf32, #tpu.memory_space<vmem>>, vector<16x32xf32>
      tpu.vector_store %arg22[%c0_92, %c0_93], %207 {strides = array<i32>} : memref<16x32xf32, #tpu.memory_space<vmem>>, vector<16x32xf32>,
    } else {
    }
    %c0 = arith.constant 0 : index
    %c0_1 = arith.constant 0 : index
    %3 = vector.load %arg22[%c0, %c0_1] : memref<16x32xf32, #tpu.memory_space<vmem>>, vector<16x32xf32>
    %c0_2 = arith.constant 0 : index
    %c0_3 = arith.constant 0 : index
    %c0_4 = arith.constant 0 : index
    %4 = vector.load %arg5[%c0_2, %c0_3, %c0_4] : memref<1x32x96xf32, #tpu.memory_space<vmem>>, vector<1x32x96xf32>
    %5 = vector.shape_cast %4 : vector<1x32x96xf32> to vector<32x96xf32>
    %cst = arith.constant dense<0.000000e+00> : vector<16x96xf32>
    %6 = tpu.matmul %3, %5, %cst {dimension_numbers = #tpu.dot_dimension_numbers<[1], [0], [0], [1], [0, 0, 1, 1], [], []>} : vector<16x32xf32>, vector<32x96xf32>, vector<16x96xf32> -> vector<16x96xf32>
    %c0_5 = arith.constant 0 : index
    %c0_6 = arith.constant 0 : index
    %c0_7 = arith.constant 0 : index
    %7 = vector.load %arg6[%c0_5, %c0_6, %c0_7] : memref<1x1x96xf32, #tpu.memory_space<vmem>>, vector<1x1x96xf32>
    %8 = vector.shape_cast %7 : vector<1x1x96xf32> to vector<1x96xf32>
    %9 = vector.broadcast %8 : vector<1x96xf32> to vector<16x96xf32>
    %10 = arith.addf %6, %9 : vector<16x96xf32>
    %11 = vector.shape_cast %10 : vector<16x96xf32> to vector<2x8x96xf32>
    %c0_8 = arith.constant 0 : index
    %c0_9 = arith.constant 0 : index
    %c0_10 = arith.constant 0 : index
    %12 = vector.load %arg2[%c0_8, %c0_9, %c0_10] : memref<2x1x8xf32, #tpu.memory_space<vmem>>, vector<2x1x8xf32>
    %13 = vector.extract_strided_slice %11 {offsets = [0, 0, 0], sizes = [2, 8, 8], strides = [1, 1, 1]} : vector<2x8x96xf32> to vector<2x8x8xf32>
    %cst_11 = arith.constant 0.353553385 : f32
    %14 = vector.broadcast %cst_11 : f32 to vector<2x8x8xf32>
    %15 = arith.mulf %13, %14 : vector<2x8x8xf32>
    %16 = vector.extract_strided_slice %11 {offsets = [0, 0, 32], sizes = [2, 8, 8], strides = [1, 1, 1]} : vector<2x8x96xf32> to vector<2x8x8xf32>
    %17 = vector.extract_strided_slice %11 {offsets = [0, 0, 64], sizes = [2, 8, 8], strides = [1, 1, 1]} : vector<2x8x96xf32> to vector<2x8x8xf32>
    "tpu.trace_start"() <{level = 10 : i32, message = "bqd,bkd->bqk"}> : () -> ()
    %cst_12 = arith.constant dense<0.000000e+00> : vector<2x8x8xf32>
    %18 = tpu.matmul %15, %16, %cst_12 {dimension_numbers = #tpu.dot_dimension_numbers<[2], [2], [1], [1], [0, 0, 0, 1, 1, 1], [0], [0]>} : vector<2x8x8xf32>, vector<2x8x8xf32>, vector<2x8x8xf32> -> vector<2x8x8xf32>
    "tpu.trace_stop"() : () -> ()
    %19 = vector.broadcast %12 : vector<2x1x8xf32> to vector<2x8x8xf32>
    %20 = arith.addf %18, %19 : vector<2x8x8xf32>
    %cst_13 = arith.constant dense<0xFF800000> : vector<2x8xf32>
    %21 = vector.multi_reduction <maximumf>, %20, %cst_13 [2] : vector<2x8x8xf32> to vector<2x8xf32>
    %22 = vector.shape_cast %21 : vector<2x8xf32> to vector<2x8x1xf32>
    %23 = vector.broadcast %22 : vector<2x8x1xf32> to vector<2x8x8xf32>
    %24 = arith.subf %20, %23 : vector<2x8x8xf32>
    %25 = math.exp %24 : vector<2x8x8xf32>
    %cst_14 = arith.constant dense<0.000000e+00> : vector<2x8xf32>
    %26 = vector.multi_reduction <add>, %25, %cst_14 [2] : vector<2x8x8xf32> to vector<2x8xf32>
    %27 = vector.shape_cast %26 : vector<2x8xf32> to vector<2x8x1xf32>
    %28 = tpu.reciprocal %27 {approx = true} : vector<2x8x1xf32> -> vector<2x8x1xf32>
    %29 = vector.broadcast %28 : vector<2x8x1xf32> to vector<2x8x8xf32>
    %30 = arith.mulf %25, %29 : vector<2x8x8xf32>
    "tpu.trace_start"() <{level = 10 : i32, message = "bqk,bkd->bqd"}> : () -> ()
    %cst_15 = arith.constant dense<0.000000e+00> : vector<2x8x8xf32>
    %31 = tpu.matmul %30, %17, %cst_15 {dimension_numbers = #tpu.dot_dimension_numbers<[2], [1], [1], [2], [0, 0, 0, 1, 1, 2], [0], [0]>} : vector<2x8x8xf32>, vector<2x8x8xf32>, vector<2x8x8xf32> -> vector<2x8x8xf32>
    "tpu.trace_stop"() : () -> ()
    %32 = vector.extract_strided_slice %11 {offsets = [0, 0, 8], sizes = [2, 8, 8], strides = [1, 1, 1]} : vector<2x8x96xf32> to vector<2x8x8xf32>
    %cst_16 = arith.constant 0.353553385 : f32
    %33 = vector.broadcast %cst_16 : f32 to vector<2x8x8xf32>
    %34 = arith.mulf %32, %33 : vector<2x8x8xf32>
    %35 = vector.extract_strided_slice %11 {offsets = [0, 0, 40], sizes = [2, 8, 8], strides = [1, 1, 1]} : vector<2x8x96xf32> to vector<2x8x8xf32>
    %36 = vector.extract_strided_slice %11 {offsets = [0, 0, 72], sizes = [2, 8, 8], strides = [1, 1, 1]} : vector<2x8x96xf32> to vector<2x8x8xf32>
    "tpu.trace_start"() <{level = 10 : i32, message = "bqd,bkd->bqk"}> : () -> ()
    %cst_17 = arith.constant dense<0.000000e+00> : vector<2x8x8xf32>
    %37 = tpu.matmul %34, %35, %cst_17 {dimension_numbers = #tpu.dot_dimension_numbers<[2], [2], [1], [1], [0, 0, 0, 1, 1, 1], [0], [0]>} : vector<2x8x8xf32>, vector<2x8x8xf32>, vector<2x8x8xf32> -> vector<2x8x8xf32>
    "tpu.trace_stop"() : () -> ()
    %38 = vector.broadcast %12 : vector<2x1x8xf32> to vector<2x8x8xf32>
    %39 = arith.addf %37, %38 : vector<2x8x8xf32>
    %cst_18 = arith.constant dense<0xFF800000> : vector<2x8xf32>
    %40 = vector.multi_reduction <maximumf>, %39, %cst_18 [2] : vector<2x8x8xf32> to vector<2x8xf32>
    %41 = vector.shape_cast %40 : vector<2x8xf32> to vector<2x8x1xf32>
    %42 = vector.broadcast %41 : vector<2x8x1xf32> to vector<2x8x8xf32>
    %43 = arith.subf %39, %42 : vector<2x8x8xf32>
    %44 = math.exp %43 : vector<2x8x8xf32>
    %cst_19 = arith.constant dense<0.000000e+00> : vector<2x8xf32>
    %45 = vector.multi_reduction <add>, %44, %cst_19 [2] : vector<2x8x8xf32> to vector<2x8xf32>
    %46 = vector.shape_cast %45 : vector<2x8xf32> to vector<2x8x1xf32>
    %47 = tpu.reciprocal %46 {approx = true} : vector<2x8x1xf32> -> vector<2x8x1xf32>
    %48 = vector.broadcast %47 : vector<2x8x1xf32> to vector<2x8x8xf32>
    %49 = arith.mulf %44, %48 : vector<2x8x8xf32>
    "tpu.trace_start"() <{level = 10 : i32, message = "bqk,bkd->bqd"}> : () -> ()
    %cst_20 = arith.constant dense<0.000000e+00> : vector<2x8x8xf32>
    %50 = tpu.matmul %49, %36, %cst_20 {dimension_numbers = #tpu.dot_dimension_numbers<[2], [1], [1], [2], [0, 0, 0, 1, 1, 2], [0], [0]>} : vector<2x8x8xf32>, vector<2x8x8xf32>, vector<2x8x8xf32> -> vector<2x8x8xf32>
    "tpu.trace_stop"() : () -> ()
    %51 = vector.extract_strided_slice %11 {offsets = [0, 0, 16], sizes = [2, 8, 8], strides = [1, 1, 1]} : vector<2x8x96xf32> to vector<2x8x8xf32>
    %cst_21 = arith.constant 0.353553385 : f32
    %52 = vector.broadcast %cst_21 : f32 to vector<2x8x8xf32>
    %53 = arith.mulf %51, %52 : vector<2x8x8xf32>
    %54 = vector.extract_strided_slice %11 {offsets = [0, 0, 48], sizes = [2, 8, 8], strides = [1, 1, 1]} : vector<2x8x96xf32> to vector<2x8x8xf32>
    %55 = vector.extract_strided_slice %11 {offsets = [0, 0, 80], sizes = [2, 8, 8], strides = [1, 1, 1]} : vector<2x8x96xf32> to vector<2x8x8xf32>
    "tpu.trace_start"() <{level = 10 : i32, message = "bqd,bkd->bqk"}> : () -> ()
    %cst_22 = arith.constant dense<0.000000e+00> : vector<2x8x8xf32>
    %56 = tpu.matmul %53, %54, %cst_22 {dimension_numbers = #tpu.dot_dimension_numbers<[2], [2], [1], [1], [0, 0, 0, 1, 1, 1], [0], [0]>} : vector<2x8x8xf32>, vector<2x8x8xf32>, vector<2x8x8xf32> -> vector<2x8x8xf32>
    "tpu.trace_stop"() : () -> ()
    %57 = vector.broadcast %12 : vector<2x1x8xf32> to vector<2x8x8xf32>
    %58 = arith.addf %56, %57 : vector<2x8x8xf32>
    %cst_23 = arith.constant dense<0xFF800000> : vector<2x8xf32>
    %59 = vector.multi_reduction <maximumf>, %58, %cst_23 [2] : vector<2x8x8xf32> to vector<2x8xf32>
    %60 = vector.shape_cast %59 : vector<2x8xf32> to vector<2x8x1xf32>
    %61 = vector.broadcast %60 : vector<2x8x1xf32> to vector<2x8x8xf32>
    %62 = arith.subf %58, %61 : vector<2x8x8xf32>
    %63 = math.exp %62 : vector<2x8x8xf32>
    %cst_24 = arith.constant dense<0.000000e+00> : vector<2x8xf32>
    %64 = vector.multi_reduction <add>, %63, %cst_24 [2] : vector<2x8x8xf32> to vector<2x8xf32>
    %65 = vector.shape_cast %64 : vector<2x8xf32> to vector<2x8x1xf32>
    %66 = tpu.reciprocal %65 {approx = true} : vector<2x8x1xf32> -> vector<2x8x1xf32>
    %67 = vector.broadcast %66 : vector<2x8x1xf32> to vector<2x8x8xf32>
    %68 = arith.mulf %63, %67 : vector<2x8x8xf32>
    "tpu.trace_start"() <{level = 10 : i32, message = "bqk,bkd->bqd"}> : () -> ()
    %cst_25 = arith.constant dense<0.000000e+00> : vector<2x8x8xf32>
    %69 = tpu.matmul %68, %55, %cst_25 {dimension_numbers = #tpu.dot_dimension_numbers<[2], [1], [1], [2], [0, 0, 0, 1, 1, 2], [0], [0]>} : vector<2x8x8xf32>, vector<2x8x8xf32>, vector<2x8x8xf32> -> vector<2x8x8xf32>
    "tpu.trace_stop"() : () -> ()
    %70 = vector.extract_strided_slice %11 {offsets = [0, 0, 24], sizes = [2, 8, 8], strides = [1, 1, 1]} : vector<2x8x96xf32> to vector<2x8x8xf32>
    %cst_26 = arith.constant 0.353553385 : f32
    %71 = vector.broadcast %cst_26 : f32 to vector<2x8x8xf32>
    %72 = arith.mulf %70, %71 : vector<2x8x8xf32>
    %73 = vector.extract_strided_slice %11 {offsets = [0, 0, 56], sizes = [2, 8, 8], strides = [1, 1, 1]} : vector<2x8x96xf32> to vector<2x8x8xf32>
    %74 = vector.extract_strided_slice %11 {offsets = [0, 0, 88], sizes = [2, 8, 8], strides = [1, 1, 1]} : vector<2x8x96xf32> to vector<2x8x8xf32>
    "tpu.trace_start"() <{level = 10 : i32, message = "bqd,bkd->bqk"}> : () -> ()
    %cst_27 = arith.constant dense<0.000000e+00> : vector<2x8x8xf32>
    %75 = tpu.matmul %72, %73, %cst_27 {dimension_numbers = #tpu.dot_dimension_numbers<[2], [2], [1], [1], [0, 0, 0, 1, 1, 1], [0], [0]>} : vector<2x8x8xf32>, vector<2x8x8xf32>, vector<2x8x8xf32> -> vector<2x8x8xf32>
    "tpu.trace_stop"() : () -> ()
    %76 = vector.broadcast %12 : vector<2x1x8xf32> to vector<2x8x8xf32>
    %77 = arith.addf %75, %76 : vector<2x8x8xf32>
    %cst_28 = arith.constant dense<0xFF800000> : vector<2x8xf32>
    %78 = vector.multi_reduction <maximumf>, %77, %cst_28 [2] : vector<2x8x8xf32> to vector<2x8xf32>
    %79 = vector.shape_cast %78 : vector<2x8xf32> to vector<2x8x1xf32>
    %80 = vector.broadcast %79 : vector<2x8x1xf32> to vector<2x8x8xf32>
    %81 = arith.subf %77, %80 : vector<2x8x8xf32>
    %82 = math.exp %81 : vector<2x8x8xf32>
    %cst_29 = arith.constant dense<0.000000e+00> : vector<2x8xf32>
    %83 = vector.multi_reduction <add>, %82, %cst_29 [2] : vector<2x8x8xf32> to vector<2x8xf32>
    %84 = vector.shape_cast %83 : vector<2x8xf32> to vector<2x8x1xf32>
    %85 = tpu.reciprocal %84 {approx = true} : vector<2x8x1xf32> -> vector<2x8x1xf32>
    %86 = vector.broadcast %85 : vector<2x8x1xf32> to vector<2x8x8xf32>
    %87 = arith.mulf %82, %86 : vector<2x8x8xf32>
    "tpu.trace_start"() <{level = 10 : i32, message = "bqk,bkd->bqd"}> : () -> ()
    %cst_30 = arith.constant dense<0.000000e+00> : vector<2x8x8xf32>
    %88 = tpu.matmul %87, %74, %cst_30 {dimension_numbers = #tpu.dot_dimension_numbers<[2], [1], [1], [2], [0, 0, 0, 1, 1, 2], [0], [0]>} : vector<2x8x8xf32>, vector<2x8x8xf32>, vector<2x8x8xf32> -> vector<2x8x8xf32>
    "tpu.trace_stop"() : () -> ()
    %89 = tpu.concatenate %31, %50, %69, %88 in 2 : vector<2x8x8xf32>, vector<2x8x8xf32>, vector<2x8x8xf32>, vector<2x8x8xf32> -> vector<2x8x32xf32>
    %90 = vector.shape_cast %89 : vector<2x8x32xf32> to vector<16x32xf32>
    %c0_31 = arith.constant 0 : index
    %c0_32 = arith.constant 0 : index
    %c0_33 = arith.constant 0 : index
    %91 = vector.load %arg7[%c0_31, %c0_32, %c0_33] : memref<1x32x32xf32, #tpu.memory_space<vmem>>, vector<1x32x32xf32>
    %92 = vector.shape_cast %91 : vector<1x32x32xf32> to vector<32x32xf32>
    %cst_34 = arith.constant dense<0.000000e+00> : vector<16x32xf32>
    %93 = tpu.matmul %90, %92, %cst_34 {dimension_numbers = #tpu.dot_dimension_numbers<[1], [0], [0], [1], [0, 0, 1, 1], [], []>} : vector<16x32xf32>, vector<32x32xf32>, vector<16x32xf32> -> vector<16x32xf32>
    %c0_35 = arith.constant 0 : index
    %c0_36 = arith.constant 0 : index
    %c0_37 = arith.constant 0 : index
    %94 = vector.load %arg8[%c0_35, %c0_36, %c0_37] : memref<1x1x32xf32, #tpu.memory_space<vmem>>, vector<1x1x32xf32>
    %95 = vector.shape_cast %94 : vector<1x1x32xf32> to vector<1x32xf32>
    %96 = vector.broadcast %95 : vector<1x32xf32> to vector<16x32xf32>
    %97 = arith.addf %93, %96 : vector<16x32xf32>
    %98 = arith.addf %3, %97 : vector<16x32xf32>
    %c0_38 = arith.constant 0 : index
    %c0_39 = arith.constant 0 : index
    %c0_40 = arith.constant 0 : index
    %99 = vector.load %arg9[%c0_38, %c0_39, %c0_40] : memref<1x1x32xf32, #tpu.memory_space<vmem>>, vector<1x1x32xf32>
    %100 = vector.shape_cast %99 : vector<1x1x32xf32> to vector<1x32xf32>
    %c0_41 = arith.constant 0 : index
    %c0_42 = arith.constant 0 : index
    %c0_43 = arith.constant 0 : index
    %101 = vector.load %arg10[%c0_41, %c0_42, %c0_43] : memref<1x1x32xf32, #tpu.memory_space<vmem>>, vector<1x1x32xf32>
    %102 = vector.shape_cast %101 : vector<1x1x32xf32> to vector<1x32xf32>
    %cst_44 = arith.constant dense<0.000000e+00> : vector<16xf32>
    %103 = vector.multi_reduction <add>, %98, %cst_44 [1] : vector<16x32xf32> to vector<16xf32>
    %104 = vector.shape_cast %103 : vector<16xf32> to vector<16x1xf32>
    %cst_45 = arith.constant 3.200000e+01 : f32
    %105 = vector.broadcast %cst_45 : f32 to vector<16x1xf32>
    %106 = arith.divf %104, %105 : vector<16x1xf32>
    %107 = vector.broadcast %106 : vector<16x1xf32> to vector<16x32xf32>
    %108 = arith.subf %98, %107 : vector<16x32xf32>
    %109 = arith.mulf %108, %108 : vector<16x32xf32>
    %cst_46 = arith.constant dense<0.000000e+00> : vector<16xf32>
    %110 = vector.multi_reduction <add>, %109, %cst_46 [1] : vector<16x32xf32> to vector<16xf32>
    %111 = vector.shape_cast %110 : vector<16xf32> to vector<16x1xf32>
    %cst_47 = arith.constant 3.200000e+01 : f32
    %112 = vector.broadcast %cst_47 : f32 to vector<16x1xf32>
    %113 = arith.divf %111, %112 : vector<16x1xf32>
    %114 = vector.broadcast %106 : vector<16x1xf32> to vector<16x32xf32>
    %115 = arith.subf %98, %114 : vector<16x32xf32>
    %cst_48 = arith.constant 9.99999996E-13 : f32
    %116 = vector.broadcast %cst_48 : f32 to vector<16x1xf32>
    %117 = arith.addf %113, %116 : vector<16x1xf32>
    %118 = math.rsqrt %117 : vector<16x1xf32>
    %119 = vector.broadcast %118 : vector<16x1xf32> to vector<16x32xf32>
    %120 = arith.mulf %115, %119 : vector<16x32xf32>
    %121 = vector.broadcast %100 : vector<1x32xf32> to vector<16x32xf32>
    %122 = arith.mulf %120, %121 : vector<16x32xf32>
    %123 = vector.broadcast %102 : vector<1x32xf32> to vector<16x32xf32>
    %124 = arith.addf %122, %123 : vector<16x32xf32>
    %c0_49 = arith.constant 0 : index
    %c0_50 = arith.constant 0 : index
    %c0_51 = arith.constant 0 : index
    %125 = vector.load %arg11[%c0_49, %c0_50, %c0_51] : memref<1x32x64xf32, #tpu.memory_space<vmem>>, vector<1x32x64xf32>
    %126 = vector.shape_cast %125 : vector<1x32x64xf32> to vector<32x64xf32>
    %cst_52 = arith.constant dense<0.000000e+00> : vector<16x64xf32>
    %127 = tpu.matmul %124, %126, %cst_52 {dimension_numbers = #tpu.dot_dimension_numbers<[1], [0], [0], [1], [0, 0, 1, 1], [], []>} : vector<16x32xf32>, vector<32x64xf32>, vector<16x64xf32> -> vector<16x64xf32>
    %c0_53 = arith.constant 0 : index
    %c0_54 = arith.constant 0 : index
    %c0_55 = arith.constant 0 : index
    %128 = vector.load %arg12[%c0_53, %c0_54, %c0_55] : memref<1x1x64xf32, #tpu.memory_space<vmem>>, vector<1x1x64xf32>
    %129 = vector.shape_cast %128 : vector<1x1x64xf32> to vector<1x64xf32>
    %130 = vector.broadcast %129 : vector<1x64xf32> to vector<16x64xf32>
    %131 = arith.addf %127, %130 : vector<16x64xf32>
    %cst_56 = arith.constant 5.000000e-01 : f32
    %132 = vector.broadcast %cst_56 : f32 to vector<16x64xf32>
    %133 = arith.mulf %132, %131 : vector<16x64xf32>
    %cst_57 = arith.constant 4.471500e-02 : f32
    %134 = vector.broadcast %cst_57 : f32 to vector<16x64xf32>
    %135 = arith.mulf %134, %131 : vector<16x64xf32>
    %136 = arith.mulf %135, %131 : vector<16x64xf32>
    %137 = arith.mulf %136, %131 : vector<16x64xf32>
    %138 = arith.addf %131, %137 : vector<16x64xf32>
    %cst_58 = arith.constant 0.797884583 : f32
    %139 = vector.broadcast %cst_58 : f32 to vector<16x64xf32>
    %140 = arith.mulf %139, %138 : vector<16x64xf32>
    %141 = math.tanh %140 : vector<16x64xf32>
    %cst_59 = arith.constant 1.000000e+00 : f32
    %142 = vector.broadcast %cst_59 : f32 to vector<16x64xf32>
    %143 = arith.addf %142, %141 : vector<16x64xf32>
    %144 = arith.mulf %133, %143 : vector<16x64xf32>
    %c0_60 = arith.constant 0 : index
    %c0_61 = arith.constant 0 : index
    %c0_62 = arith.constant 0 : index
    %145 = vector.load %arg13[%c0_60, %c0_61, %c0_62] : memref<1x64x32xf32, #tpu.memory_space<vmem>>, vector<1x64x32xf32>
    %146 = vector.shape_cast %145 : vector<1x64x32xf32> to vector<64x32xf32>
    %cst_63 = arith.constant dense<0.000000e+00> : vector<16x32xf32>
    %147 = tpu.matmul %144, %146, %cst_63 {dimension_numbers = #tpu.dot_dimension_numbers<[1], [0], [0], [1], [0, 0, 1, 1], [], []>} : vector<16x64xf32>, vector<64x32xf32>, vector<16x32xf32> -> vector<16x32xf32>
    %c0_64 = arith.constant 0 : index
    %c0_65 = arith.constant 0 : index
    %c0_66 = arith.constant 0 : index
    %148 = vector.load %arg14[%c0_64, %c0_65, %c0_66] : memref<1x1x32xf32, #tpu.memory_space<vmem>>, vector<1x1x32xf32>
    %149 = vector.shape_cast %148 : vector<1x1x32xf32> to vector<1x32xf32>
    %150 = vector.broadcast %149 : vector<1x32xf32> to vector<16x32xf32>
    %151 = arith.addf %147, %150 : vector<16x32xf32>
    %152 = arith.addf %124, %151 : vector<16x32xf32>
    %c0_67 = arith.constant 0 : index
    %c0_68 = arith.constant 0 : index
    %c0_69 = arith.constant 0 : index
    %153 = vector.load %arg15[%c0_67, %c0_68, %c0_69] : memref<1x1x32xf32, #tpu.memory_space<vmem>>, vector<1x1x32xf32>
    %154 = vector.shape_cast %153 : vector<1x1x32xf32> to vector<1x32xf32>
    %c0_70 = arith.constant 0 : index
    %c0_71 = arith.constant 0 : index
    %c0_72 = arith.constant 0 : index
    %155 = vector.load %arg16[%c0_70, %c0_71, %c0_72] : memref<1x1x32xf32, #tpu.memory_space<vmem>>, vector<1x1x32xf32>
    %156 = vector.shape_cast %155 : vector<1x1x32xf32> to vector<1x32xf32>
    %cst_73 = arith.constant dense<0.000000e+00> : vector<16xf32>
    %157 = vector.multi_reduction <add>, %152, %cst_73 [1] : vector<16x32xf32> to vector<16xf32>
    %158 = vector.shape_cast %157 : vector<16xf32> to vector<16x1xf32>
    %cst_74 = arith.constant 3.200000e+01 : f32
    %159 = vector.broadcast %cst_74 : f32 to vector<16x1xf32>
    %160 = arith.divf %158, %159 : vector<16x1xf32>
    %161 = vector.broadcast %160 : vector<16x1xf32> to vector<16x32xf32>
    %162 = arith.subf %152, %161 : vector<16x32xf32>
    %163 = arith.mulf %162, %162 : vector<16x32xf32>
    %cst_75 = arith.constant dense<0.000000e+00> : vector<16xf32>
    %164 = vector.multi_reduction <add>, %163, %cst_75 [1] : vector<16x32xf32> to vector<16xf32>
    %165 = vector.shape_cast %164 : vector<16xf32> to vector<16x1xf32>
    %cst_76 = arith.constant 3.200000e+01 : f32
    %166 = vector.broadcast %cst_76 : f32 to vector<16x1xf32>
    %167 = arith.divf %165, %166 : vector<16x1xf32>
    %168 = vector.broadcast %160 : vector<16x1xf32> to vector<16x32xf32>
    %169 = arith.subf %152, %168 : vector<16x32xf32>
    %cst_77 = arith.constant 9.99999996E-13 : f32
    %170 = vector.broadcast %cst_77 : f32 to vector<16x1xf32>
    %171 = arith.addf %167, %170 : vector<16x1xf32>
    %172 = math.rsqrt %171 : vector<16x1xf32>
    %173 = vector.broadcast %172 : vector<16x1xf32> to vector<16x32xf32>
    %174 = arith.mulf %169, %173 : vector<16x32xf32>
    %175 = vector.broadcast %154 : vector<1x32xf32> to vector<16x32xf32>
    %176 = arith.mulf %174, %175 : vector<16x32xf32>
    %177 = vector.broadcast %156 : vector<1x32xf32> to vector<16x32xf32>
    %178 = arith.addf %176, %177 : vector<16x32xf32>
    %c0_78 = arith.constant 0 : index
    %c0_79 = arith.constant 0 : index
    %179 = vector.load %arg22[%c0_78, %c0_79] : memref<16x32xf32, #tpu.memory_space<vmem>>, vector<16x32xf32>
    tpu.vector_store %arg22[%c0_78, %c0_79], %178 {strides = array<i32>} : memref<16x32xf32, #tpu.memory_space<vmem>>, vector<16x32xf32>,
    %c1_i32 = arith.constant 1 : i32
    %180 = arith.cmpi eq, %arg0, %c1_i32 : i32
    %181 = arith.extui %180 : i1 to i32
    %c0_i32_80 = arith.constant 0 : i32
    %182 = arith.cmpi ne, %181, %c0_i32_80 : i32
    scf.if %182 {
      %183 = vector.shape_cast %178 : vector<16x32xf32> to vector<2x8x32xf32>
      %184 = vector.extract_strided_slice %183 {offsets = [0, 0, 0], sizes = [2, 1, 32], strides = [1, 1, 1]} : vector<2x8x32xf32> to vector<2x1x32xf32>
      %185 = vector.shape_cast %184 : vector<2x1x32xf32> to vector<2x32xf32>
      %c0_81 = arith.constant 0 : index
      %c0_82 = arith.constant 0 : index
      %186 = vector.load %arg17[%c0_81, %c0_82] : memref<32x32xf32, #tpu.memory_space<vmem>>, vector<32x32xf32>
      %cst_83 = arith.constant dense<0.000000e+00> : vector<2x32xf32>
      %187 = tpu.matmul %185, %186, %cst_83 {dimension_numbers = #tpu.dot_dimension_numbers<[1], [0], [0], [1], [0, 0, 1, 1], [], []>} : vector<2x32xf32>, vector<32x32xf32>, vector<2x32xf32> -> vector<2x32xf32>
      %c0_84 = arith.constant 0 : index
      %c0_85 = arith.constant 0 : index
      %188 = vector.load %arg18[%c0_84, %c0_85] : memref<1x32xf32, #tpu.memory_space<vmem>>, vector<1x32xf32>
      %189 = vector.broadcast %188 : vector<1x32xf32> to vector<2x32xf32>
      %190 = arith.addf %187, %189 : vector<2x32xf32>
      %cst_86 = arith.constant 0.000000e+00 : f32
      %191 = vector.broadcast %cst_86 : f32 to vector<2x32xf32>
      %192 = arith.maximumf %190, %191 : vector<2x32xf32>
      %c0_87 = arith.constant 0 : index
      %c0_88 = arith.constant 0 : index
      %193 = vector.load %arg19[%c0_87, %c0_88] : memref<32x128xf32, #tpu.memory_space<vmem>>, vector<32x128xf32>
      %cst_89 = arith.constant dense<0.000000e+00> : vector<2x128xf32>
      %194 = tpu.matmul %192, %193, %cst_89 {dimension_numbers = #tpu.dot_dimension_numbers<[1], [0], [0], [1], [0, 0, 1, 1], [], []>} : vector<2x32xf32>, vector<32x128xf32>, vector<2x128xf32> -> vector<2x128xf32>
      %c0_90 = arith.constant 0 : index
      %c0_91 = arith.constant 0 : index
      %195 = vector.load %arg20[%c0_90, %c0_91] : memref<1x128xf32, #tpu.memory_space<vmem>>, vector<1x128xf32>
      %196 = vector.broadcast %195 : vector<1x128xf32> to vector<2x128xf32>
      %197 = arith.addf %194, %196 : vector<2x128xf32>
      %c0_92 = arith.constant 0 : index
      %c0_93 = arith.constant 0 : index
      %198 = vector.load %arg21[%c0_92, %c0_93] : memref<2x128xf32, #tpu.memory_space<vmem>>, vector<2x128xf32>
      tpu.vector_store %arg21[%c0_92, %c0_93], %197 {strides = array<i32>} : memref<2x128xf32, #tpu.memory_space<vmem>>, vector<2x128xf32>,
    } else {
    }
    return
  }
  func.func @transform_0(%arg0: i32) -> (i32, i32) {
    %c0_i32 = arith.constant 0 : i32
    %c0_i32_0 = arith.constant 0 : i32
    %c0_i32_1 = arith.constant 0 : i32
    return %c0_i32, %c0_i32_0 : i32, i32
  }
  func.func @transform_1(%arg0: i32) -> (i32, i32, i32) {
    %c0_i32 = arith.constant 0 : i32
    %c0_i32_0 = arith.constant 0 : i32
    %c0_i32_1 = arith.constant 0 : i32
    %c0_i32_2 = arith.constant 0 : i32
    return %c0_i32, %c0_i32_0, %c0_i32_1 : i32, i32, i32
  }
  func.func @transform_2(%arg0: i32) -> (i32, i32) {
    %c0_i32 = arith.constant 0 : i32
    %c0_i32_0 = arith.constant 0 : i32
    %c0_i32_1 = arith.constant 0 : i32
    return %c0_i32, %c0_i32_0 : i32, i32
  }
  func.func @transform_3(%arg0: i32) -> (i32, i32) {
    %c0_i32 = arith.constant 0 : i32
    %c0_i32_0 = arith.constant 0 : i32
    %c0_i32_1 = arith.constant 0 : i32
    return %c0_i32, %c0_i32_0 : i32, i32
  }
  func.func @transform_4(%arg0: i32) -> (i32, i32, i32) {
    %c0_i32 = arith.constant 0 : i32
    %c0_i32_0 = arith.constant 0 : i32
    %c0_i32_1 = arith.constant 0 : i32
    return %arg0, %c0_i32, %c0_i32_0 : i32, i32, i32
  }
  func.func @transform_5(%arg0: i32) -> (i32, i32, i32) {
    %c0_i32 = arith.constant 0 : i32
    %c0_i32_0 = arith.constant 0 : i32
    %c0_i32_1 = arith.constant 0 : i32
    return %arg0, %c0_i32, %c0_i32_0 : i32, i32, i32
  }
  func.func @transform_6(%arg0: i32) -> (i32, i32, i32) {
    %c0_i32 = arith.constant 0 : i32
    %c0_i32_0 = arith.constant 0 : i32
    %c0_i32_1 = arith.constant 0 : i32
    return %arg0, %c0_i32, %c0_i32_0 : i32, i32, i32
  }
  func.func @transform_7(%arg0: i32) -> (i32, i32, i32) {
    %c0_i32 = arith.constant 0 : i32
    %c0_i32_0 = arith.constant 0 : i32
    %c0_i32_1 = arith.constant 0 : i32
    return %arg0, %c0_i32, %c0_i32_0 : i32, i32, i32
  }
  func.func @transform_8(%arg0: i32) -> (i32, i32, i32) {
    %c0_i32 = arith.constant 0 : i32
    %c0_i32_0 = arith.constant 0 : i32
    %c0_i32_1 = arith.constant 0 : i32
    return %arg0, %c0_i32, %c0_i32_0 : i32, i32, i32
  }
  func.func @transform_9(%arg0: i32) -> (i32, i32, i32) {
    %c0_i32 = arith.constant 0 : i32
    %c0_i32_0 = arith.constant 0 : i32
    %c0_i32_1 = arith.constant 0 : i32
    return %arg0, %c0_i32, %c0_i32_0 : i32, i32, i32
  }
  func.func @transform_10(%arg0: i32) -> (i32, i32, i32) {
    %c0_i32 = arith.constant 0 : i32
    %c0_i32_0 = arith.constant 0 : i32
    %c0_i32_1 = arith.constant 0 : i32
    return %arg0, %c0_i32, %c0_i32_0 : i32, i32, i32
  }
  func.func @transform_11(%arg0: i32) -> (i32, i32, i32) {
    %c0_i32 = arith.constant 0 : i32
    %c0_i32_0 = arith.constant 0 : i32
    %c0_i32_1 = arith.constant 0 : i32
    return %arg0, %c0_i32, %c0_i32_0 : i32, i32, i32
  }
  func.func @transform_12(%arg0: i32) -> (i32, i32, i32) {
    %c0_i32 = arith.constant 0 : i32
    %c0_i32_0 = arith.constant 0 : i32
    %c0_i32_1 = arith.constant 0 : i32
    return %arg0, %c0_i32, %c0_i32_0 : i32, i32, i32
  }
  func.func @transform_13(%arg0: i32) -> (i32, i32, i32) {
    %c0_i32 = arith.constant 0 : i32
    %c0_i32_0 = arith.constant 0 : i32
    %c0_i32_1 = arith.constant 0 : i32
    return %arg0, %c0_i32, %c0_i32_0 : i32, i32, i32
  }
  func.func @transform_14(%arg0: i32) -> (i32, i32, i32) {
    %c0_i32 = arith.constant 0 : i32
    %c0_i32_0 = arith.constant 0 : i32
    %c0_i32_1 = arith.constant 0 : i32
    return %arg0, %c0_i32, %c0_i32_0 : i32, i32, i32
  }
  func.func @transform_15(%arg0: i32) -> (i32, i32, i32) {
    %c0_i32 = arith.constant 0 : i32
    %c0_i32_0 = arith.constant 0 : i32
    %c0_i32_1 = arith.constant 0 : i32
    return %arg0, %c0_i32, %c0_i32_0 : i32, i32, i32
  }
  func.func @transform_16(%arg0: i32) -> (i32, i32) {
    %c0_i32 = arith.constant 0 : i32
    %c0_i32_0 = arith.constant 0 : i32
    %c0_i32_1 = arith.constant 0 : i32
    return %c0_i32, %c0_i32_0 : i32, i32
  }
  func.func @transform_17(%arg0: i32) -> (i32, i32) {
    %c0_i32 = arith.constant 0 : i32
    %c0_i32_0 = arith.constant 0 : i32
    %c0_i32_1 = arith.constant 0 : i32
    return %c0_i32, %c0_i32_0 : i32, i32
  }
  func.func @transform_18(%arg0: i32) -> (i32, i32) {
    %c0_i32 = arith.constant 0 : i32
    %c0_i32_0 = arith.constant 0 : i32
    %c0_i32_1 = arith.constant 0 : i32
    return %c0_i32, %c0_i32_0 : i32, i32
  }
  func.func @transform_19(%arg0: i32) -> (i32, i32) {
    %c0_i32 = arith.constant 0 : i32
    %c0_i32_0 = arith.constant 0 : i32
    %c0_i32_1 = arith.constant 0 : i32
    return %c0_i32, %c0_i32_0 : i32, i32
  }
  func.func @transform_20(%arg0: i32) -> (i32, i32) {
    %c0_i32 = arith.constant 0 : i32
    %c0_i32_0 = arith.constant 0 : i32
    %c0_i32_1 = arith.constant 0 : i32
    return %c0_i32, %c0_i32_0 : i32, i32
  }
}

</mosaic_0001>

<bundles_post_ra>
// kernel: tpu_custom_call.1
= control target key start
LH: loop header
LB: loop body
LE: loop exit
PB: predicated region body
PF: predicated region fallthrough
CT: control target
= control target key end

     0   :  { %s5208_s0 = inlined_call_operand.hbm [shape: f32[16,32], index: 0, kind: input, shape index: {}]   ;;  %s5209_s1 = inlined_call_operand.hbm [shape: f32[2,1,8], index: 1, kind: input, shape index: {}]   ;;  %s5210_s2 = inlined_call_operand.hbm [shape: f32[1,32], index: 2, kind: input, shape index: {}]   ;;  %s5211_s3 = inlined_call_operand.hbm [shape: f32[1,32], index: 3, kind: input, shape index: {}]   ;;  %s5212_s4 = inlined_call_operand.vmem [shape: f32[2,32,96], index: 4, kind: input, shape index: {}]   ;;  %s5213_s5 = inlined_call_operand.hbm [shape: f32[2,1,96], index: 5, kind: input, shape index: {}]   ;;  %s5214_s6 = inlined_call_operand.vmem [shape: f32[2,32,32], index: 6, kind: input, shape index: {}]   ;;  %s5215_s7 = inlined_call_operand.hbm [shape: f32[2,1,32], index: 7, kind: input, shape index: {}]   ;;  %s5216_s8 = inlined_call_operand.hbm [shape: f32[2,1,32], index: 8, kind: input, shape index: {}]   ;;  %s5217_s9 = inlined_call_operand.hbm [shape: f32[2,1,32], index: 9, kind: input, shape index: {}]   ;;  %s5218_s10 = inlined_call_operand.vmem [shape: f32[2,32,64], index: 10, kind: input, shape index: {}]   ;;  %s5219_s11 = inlined_call_operand.hbm [shape: f32[2,1,64], index: 11, kind: input, shape index: {}]   ;;  %s5220_s12 = inlined_call_operand.vmem [shape: f32[2,64,32], index: 12, kind: input, shape index: {}]   ;;  %s5221_s13 = inlined_call_operand.hbm [shape: f32[2,1,32], index: 13, kind: input, shape index: {}]   ;;  %s5222_s14 = inlined_call_operand.hbm [shape: f32[2,1,32], index: 14, kind: input, shape index: {}]   ;;  %s5223_s15 = inlined_call_operand.hbm [shape: f32[2,1,32], index: 15, kind: input, shape index: {}]   ;;  %s5224_s16 = inlined_call_operand.hbm [shape: f32[32,32], index: 16, kind: input, shape index: {}]   ;;  %s5225_s17 = inlined_call_operand.hbm [shape: f32[1,32], index: 17, kind: input, shape index: {}]   ;;  %s5226_s18 = inlined_call_operand.vmem [shape: f32[32,128], index: 18, kind: input, shape index: {}]   ;;  %s5227_s19 = inlined_call_operand.hbm [shape: f32[1,128], index: 19, kind: input, shape index: {}]   ;;  %s5228_s20 = inlined_call_operand.hbm [shape: f32[2,128], index: 20, kind: output, shape index: {}]  }
   0x1   :  { %5252 = sst [smem:[#allocation38_spill]] %s5208_s0 }
   0x2   :  { %5253 = sst [smem:[#allocation39_spill]] %s5209_s1 }
   0x3   :  { %5254 = sst [smem:[#allocation40_spill]] %s5210_s2 }
   0x4   :  { %5255 = sst [smem:[#allocation41_spill]] %s5211_s3 }
   0x5   :  { %5256 = sst [smem:[#allocation42_spill]] %s5212_s4 }
   0x6   :  { %5257 = sst [smem:[#allocation43_spill]] %s5213_s5 }
   0x7   :  { %5258 = sst [smem:[#allocation44_spill]] %s5214_s6 }
   0x8   :  { %5259 = sst [smem:[#allocation45_spill]] %s5215_s7 }
   0x9   :  { %5260 = sst [smem:[#allocation46_spill]] %s5218_s10 }
   0xa   :  { %5261 = sst [smem:[#allocation47_spill]] %s5220_s12 }
   0xb   :  { %5262 = sst [smem:[#allocation48_spill]] %s5226_s18 }
   0xc   :  { %5263 = sst [smem:[#allocation49_spill]] %s5228_s20 }
   0xd   :  { %25 = vsyncpa [#allocation4], 0 }
   0xe   :  { %26 = vsyncpa [#allocation7], 0 }
   0xf   :  { %27 = vsyncpa [#allocation10], 0 }
  0x10   :  { %28 = vsyncpa [#allocation22], 0 }
  0x11   :  { %29 = vsyncpa [#allocation5], 0  ;;  %s4570_s1 = smov 0   ;;  %s4572_s22 = smov 0  }
  0x12   :  { %s4574_s23 = smov 0   ;;  %s4576_s24 = smov 0  }
  0x13 LB: > { %5264 = sst [smem:[#allocation32_spill]] %s4417_s22  ;;  %s4427_s2 = smov [#allocation3]   ;;  %s4425_s24 = sphi %s4576_s24, %s5324_s24   ;;  %s4421_s23 = sphi %s4574_s23, %s5327_s23   ;;  %s4417_s22 = sphi %s4572_s22, %s5326_s22   ;;  %s4413_s1 = sphi %s4570_s1, %s5325_s1  }
  0x14   : > { %5265 = sst [smem:[#allocation33_spill]] %s4421_s23  ;;  %s553_s25 = sshll.u32 %s4427_s2, 4  ;;  %s554_s25 = int_to_ptr.vmem [resolvable:$true] %s553_s25 }
  0x15   : > { %s4591_s3 = sadd.s32 4294967295, %s4425_s24   ;;  %p3396_p0 = scmp.ge.s32.totalorder %s4425_s24, 1 }
  0x16   : > { %p5239_p1 = scmp.eq.s32.totalorder %s4591_s3, 0  ;;  %p541_p2 = scmp.lt.s32.totalorder %s4425_s24, 3 }
  0x17   : > { %s4610_s28 = sadd.s32 1, %s4425_s24   ;;  %s3944_s29 = scalar_lea.vmem %s554_s25, 256 }
  0x18   : > { %p4597_p4 = pnand %p3396_p0, %p541_p2  ;;  %5269 = sst [smem:[#allocation35_spill]] %s4610_s28 }
  0x19   : > { %p3945_p8 = scmp.ne.s32.totalorder %s554_s25, %s3944_s29  ;;  %p3952_p11 = scmp.lt.s32.totalorder %s554_s25, %s554_s25 }
  0x1a   : > { %s5266_s26 = scalar_select %p4597_p4, 1, 0 }
  0x1b   : > { %p3759_p5 = pneg %p4597_p4  ;;  %p3953_p12 = scmp.lt.s32.totalorder %s3944_s29, %s3944_s29 }
  0x1c   : > { %5267 = sst [smem:[#allocation34_spill]] %s5266_s26 }
  0x1d   : > { %p4605_p6 = pnand %p3759_p5, %p5239_p1  ;;  %p3954_p13 = por %p3953_p12, %p3952_p11 }
  0x1f   : > { %s5268_s27 = scalar_select %p4605_p6, 1, 0 }
  0x20   : > { %p4614_p7 = pneg %p4605_p6 }
  0x22   : > { %s5270_s4 = scalar_select %p4614_p7, 1, 0 }
  0x23   : > { %p3947_p9 = pnand %p3945_p8, %p4614_p7 }
  0x25   : > { %p3948_p10 = pneg %p3947_p9 }
  0x27   : > { %p3955_p0 = pnand %p3954_p13, %p3948_p10 }
  0x29   : > { %3958 = shalt.err (!%p3955_p0)
}
  0x2a   : > { %s5231_s30 = smov 128   ;;  %s5232_s0 = smov 8  }
  0x2b   : > { %s5271_s29 = sld [smem:[#allocation38_spill]]  ;;  %s149_s20 = ssub.s32 %s4425_s24, %s4610_s28 }
  0x2c   : > { %s152_s18 = sadd.s32 1, %s4421_s23  ;;  %p150_p2 = scmp.eq.s32.totalorder %s149_s20, 0 }
  0x2d   : > { %p159_p5 = scmp.ne.s32.totalorder %s4421_s23, %s4417_s22  ;;  %p160_p8 = scmp.eq.s32.totalorder %s4425_s24, 0 }
  0x2e   : > { %p165_p9 = scmp.ne.s32.totalorder %s4417_s22, %s4413_s1  ;;  %p3813_p12 = scmp.lt.s32.totalorder %s4425_s24, 2 }
  0x2f   : > { %s4637_s12 = scalar_select %p150_p2, %s4421_s23, %s152_s18  }
  0x30   : > { %p161_p10 = por %p160_p8, %p159_p5  ;;  %p4641_p11 = por %p5239_p1, %p165_p9 }
  0x31   : > { %3762 = dma.hbm_to_vmem [thread:$0]  (!%p4605_p6), %s5271_s29, 256, %s554_s25, [#allocation4], %s5231_s30, %s5231_s30, %s5232_s0  }
  0x32   : > { %5272 = sst [smem:[#allocation36_spill]] %s4637_s12  ;;  %s648_s6 = sand.u32 1, %s4425_s24  }
  0x33   : > { %s5273_s10 = scalar_select %p4641_p11, 1, 0 }
  0x34   : > { %s4648_s26 = sand.u32 1, %s4421_s23   ;;  %s4651_s25 = sshll.u32 %s4425_s24, 4 }
  0x35   : > { %5274 = sst [smem:[#allocation37_spill]] %s5273_s10  ;;  %s651_s1 = scalar_lea.vmem [#allocation11], %s4648_s26 }
  0x36   : > { %s5275_s5 = sld [smem:[#allocation43_spill]]  ;;  %s658_s2 = sshll.u32 %s651_s1, 4  ;;  %s4660_s2 = int_to_ptr.vmem [resolvable:$true] %s658_s2 }
  0x37   : > { %p4662_p13 = pnand %p3813_p12, %p161_p10  ;;  %s5277_s7 = sld [smem:[#allocation45_spill]] }
  0x38   : > { %s676_s20 = scalar_lea.vmem [#allocation12], %s4648_s26  ;;  %s4673_s12 = scalar_lea.sflag [#allocation4], %s648_s6 }
  0x39   : > { %s683_s21 = sshll.u32 %s676_s20, 4  ;;  %p4679_p2 = pneg %p4662_p13  ;;  %s684_s21 = int_to_ptr.vmem [resolvable:$true] %s683_s21 }
  0x3b   : > { %s5278_s1 = scalar_select %p4679_p2, 1, 0 }
  0x3c   : > { %s4657_s18 = scalar_lea.hbm %s5275_s5, %s4651_s25  ;;  %s3964_s24 = scalar_lea.hbm %s5275_s5, 32 }
  0x3d   : > { %s4670_s0 = scalar_lea.hbm %s5277_s7, %s4651_s25  ;;  %s3959_s23 = scalar_lea.hbm %s4657_s18, 16 }
  0x3e   : > { %p3960_p0 = scmp.ne.s32.totalorder %s4657_s18, %s3959_s23  ;;  %p3965_p9 = scmp.lt.s32.totalorder %s4657_s18, %s5275_s5 }
  0x3f   : > { %p3966_p10 = scmp.lt.s32.totalorder %s3964_s24, %s3959_s23 }
  0x40   : > { %p3962_p5 = pnand %p4679_p2, %p3960_p0 }
  0x41   : > { %p3967_p12 = por %p3966_p10, %p3965_p9 }
  0x42   : > { %p3963_p8 = pneg %p3962_p5 }
  0x44   : > { %p3968_p3 = pnand %p3967_p12, %p3963_p8 }
  0x46   : > { %3971 = shalt.err (!%p3968_p3)
}
  0x47   : > { %s3972_s6 = scalar_lea.vmem %s4660_s2, 16  ;;  %s4430_s20 = smov [#allocation11]  }
  0x48   : > { %p3973_p1 = scmp.ne.s32.totalorder %s4660_s2, %s3972_s6  ;;  %s3977_s28 = sshll.u32 %s4430_s20, 4  ;;  %s3978_s28 = int_to_ptr.vmem [resolvable:$false] %s3977_s28 }
  0x49   : > { %s3979_s30 = scalar_lea.vmem %s3978_s28, 32  ;;  %p3980_p11 = scmp.lt.s32.totalorder %s4660_s2, %s3978_s28 }
  0x4a   : > { %p3975_p0 = pnand %p3973_p1, %p4679_p2  ;;  %p3981_p4 = scmp.lt.s32.totalorder %s3979_s30, %s3972_s6 }
  0x4c   : > { %p3976_p5 = pneg %p3975_p0  ;;  %p3982_p6 = por %p3981_p4, %p3980_p11 }
  0x4e   : > { %p3983_p7 = pnand %p3982_p6, %p3976_p5 }
  0x50   : > { %3986 = shalt.err (!%p3983_p7)
}
  0x51   : > { %3784 = dma.hbm_to_vmem [thread:$0]  (!%p4662_p13), %s4657_s18, 16, %s4660_s2, %s4673_s12  }
  0x52   : > { %s3987_s10 = scalar_lea.hbm %s4670_s0, 16  ;;  %s3992_s24 = scalar_lea.hbm %s5277_s7, 32 }
  0x53   : > { %p3988_p1 = scmp.ne.s32.totalorder %s4670_s0, %s3987_s10  ;;  %p3993_p4 = scmp.lt.s32.totalorder %s4670_s0, %s5277_s7 }
  0x54   : > { %p3994_p6 = scmp.lt.s32.totalorder %s3992_s24, %s3987_s10 }
  0x55   : > { %p3990_p3 = pnand %p3988_p1, %p4679_p2 }
  0x56   : > { %p3995_p7 = por %p3994_p6, %p3993_p4 }
  0x57   : > { %p3991_p8 = pneg %p3990_p3 }
  0x59   : > { %p3996_p11 = pnand %p3995_p7, %p3991_p8 }
  0x5b   : > { %3999 = shalt.err (!%p3996_p11)
}
  0x5c   : > { %s4000_s28 = scalar_lea.vmem %s684_s21, 16  ;;  %s4431_s18 = smov [#allocation12]  }
  0x5d   : > { %p4001_p9 = scmp.ne.s32.totalorder %s684_s21, %s4000_s28  ;;  %s4005_s2 = sshll.u32 %s4431_s18, 4  ;;  %s4006_s2 = int_to_ptr.vmem [resolvable:$false] %s4005_s2 }
  0x5e   : > { %s4007_s30 = scalar_lea.vmem %s4006_s2, 32  ;;  %p4008_p0 = scmp.lt.s32.totalorder %s684_s21, %s4006_s2 }
  0x5f   : > { %p4003_p10 = pnand %p4001_p9, %p4679_p2  ;;  %p4009_p5 = scmp.lt.s32.totalorder %s4007_s30, %s4000_s28 }
  0x61   : > { %p4004_p12 = pneg %p4003_p10  ;;  %p4010_p1 = por %p4009_p5, %p4008_p0 }
  0x63   : > { %p4011_p3 = pnand %p4010_p1, %p4004_p12 }
  0x65   : > { %4014 = shalt.err (!%p4011_p3)
}
  0x66   : > { %3787 = dma.hbm_to_vmem [thread:$0]  (!%p4662_p13), %s4670_s0, 16, %s684_s21, %s4673_s12  }
  0x67   : > { %s698_s23 = scalar_lea.hbm %s5216_s8, %s4651_s25  ;;  %s693_s24 = scalar_lea.vmem [#allocation13], %s4648_s26 }
  0x68   : > { %s700_s6 = sshll.u32 %s693_s24, 4  ;;  %s4015_s20 = scalar_lea.hbm %s698_s23, 16  ;;  %s701_s6 = int_to_ptr.vmem [resolvable:$true] %s700_s6 }
  0x69   : > { %p4016_p8 = scmp.ne.s32.totalorder %s698_s23, %s4015_s20  ;;  %s4020_s2 = scalar_lea.hbm %s5216_s8, 32 }
  0x6a   : > { %p4021_p7 = scmp.lt.s32.totalorder %s698_s23, %s5216_s8  ;;  %p4022_p11 = scmp.lt.s32.totalorder %s4020_s2, %s4015_s20 }
  0x6b   : > { %p4018_p4 = pnand %p4016_p8, %p4679_p2 }
  0x6c   : > { %p4023_p9 = por %p4022_p11, %p4021_p7 }
  0x6d   : > { %p4019_p6 = pneg %p4018_p4 }
  0x6f   : > { %p4024_p10 = pnand %p4023_p9, %p4019_p6 }
  0x71   : > { %4027 = shalt.err (!%p4024_p10)
}
  0x72   : > { %s4028_s0 = scalar_lea.vmem %s701_s6, 16  ;;  %s4432_s21 = smov [#allocation13]  }
  0x73   : > { %p4029_p12 = scmp.ne.s32.totalorder %s701_s6, %s4028_s0  ;;  %s4033_s10 = sshll.u32 %s4432_s21, 4  ;;  %s4034_s10 = int_to_ptr.vmem [resolvable:$false] %s4033_s10 }
  0x74   : > { %s4035_s22 = scalar_lea.vmem %s4034_s10, 32  ;;  %p4036_p1 = scmp.lt.s32.totalorder %s701_s6, %s4034_s10 }
  0x75   : > { %p4031_p0 = pnand %p4029_p12, %p4679_p2  ;;  %p4037_p3 = scmp.lt.s32.totalorder %s4035_s22, %s4028_s0 }
  0x77   : > { %p4032_p5 = pneg %p4031_p0  ;;  %p4038_p8 = por %p4037_p3, %p4036_p1 }
  0x79   : > { %p4039_p4 = pnand %p4038_p8, %p4032_p5 }
  0x7b   : > { %4042 = shalt.err (!%p4039_p4)
}
  0x7c   : > { %3790 = dma.hbm_to_vmem [thread:$0]  (!%p4662_p13), %s698_s23, 16, %s701_s6, %s4673_s12  }
  0x7d   : > { %s715_s20 = scalar_lea.hbm %s5217_s9, %s4651_s25  ;;  %s710_s28 = scalar_lea.vmem [#allocation14], %s4648_s26 }
  0x7e   : > { %s717_s18 = sshll.u32 %s710_s28, 4  ;;  %s4043_s2 = scalar_lea.hbm %s715_s20, 16  ;;  %s718_s18 = int_to_ptr.vmem [resolvable:$true] %s717_s18 }
  0x7f   : > { %p4044_p6 = scmp.ne.s32.totalorder %s715_s20, %s4043_s2  ;;  %s4048_s21 = scalar_lea.hbm %s5217_s9, 32 }
  0x80   : > { %p4049_p9 = scmp.lt.s32.totalorder %s715_s20, %s5217_s9  ;;  %p4050_p10 = scmp.lt.s32.totalorder %s4048_s21, %s4043_s2 }
  0x81   : > { %p4046_p7 = pnand %p4044_p6, %p4679_p2 }
  0x82   : > { %p4051_p12 = por %p4050_p10, %p4049_p9 }
  0x83   : > { %p4047_p11 = pneg %p4046_p7 }
  0x85   : > { %p4052_p0 = pnand %p4051_p12, %p4047_p11 }
  0x87   : > { %4055 = shalt.err (!%p4052_p0)
}
  0x88   : > { %s4056_s23 = scalar_lea.vmem %s718_s18, 16  ;;  %s4433_s6 = smov [#allocation14]  }
  0x89   : > { %p4057_p5 = scmp.ne.s32.totalorder %s718_s18, %s4056_s23  ;;  %s4061_s5 = sshll.u32 %s4433_s6, 4  ;;  %s4062_s5 = int_to_ptr.vmem [resolvable:$false] %s4061_s5 }
  0x8a   : > { %s4063_s24 = scalar_lea.vmem %s4062_s5, 32  ;;  %p4064_p8 = scmp.lt.s32.totalorder %s718_s18, %s4062_s5 }
  0x8b   : > { %p4059_p1 = pnand %p4057_p5, %p4679_p2  ;;  %p4065_p4 = scmp.lt.s32.totalorder %s4063_s24, %s4056_s23 }
  0x8d   : > { %p4060_p3 = pneg %p4059_p1  ;;  %p4066_p6 = por %p4065_p4, %p4064_p8 }
  0x8f   : > { %p4067_p7 = pnand %p4066_p6, %p4060_p3 }
  0x91   : > { %4070 = shalt.err (!%p4067_p7)
}
  0x92   : > { %3793 = dma.hbm_to_vmem [thread:$0]  (!%p4662_p13), %s715_s20, 16, %s718_s18, %s4673_s12  }
  0x93   : > { %s740_s30 = scalar_lea.hbm %s5219_s11, %s4651_s25  ;;  %s735_s0 = scalar_lea.vmem [#allocation15], %s4648_s26 }
  0x94   : > { %s742_s21 = sshll.u32 %s735_s0, 4  ;;  %s4071_s10 = scalar_lea.hbm %s740_s30, 16  ;;  %s743_s21 = int_to_ptr.vmem [resolvable:$true] %s742_s21 }
  0x95   : > { %p4072_p11 = scmp.ne.s32.totalorder %s740_s30, %s4071_s10  ;;  %s4076_s6 = scalar_lea.hbm %s5219_s11, 32 }
  0x96   : > { %p4077_p12 = scmp.lt.s32.totalorder %s740_s30, %s5219_s11  ;;  %p4078_p0 = scmp.lt.s32.totalorder %s4076_s6, %s4071_s10 }
  0x97   : > { %p4074_p9 = pnand %p4072_p11, %p4679_p2 }
  0x98   : > { %p4079_p5 = por %p4078_p0, %p4077_p12 }
  0x99   : > { %p4075_p10 = pneg %p4074_p9 }
  0x9b   : > { %p4080_p1 = pnand %p4079_p5, %p4075_p10 }
  0x9d   : > { %4083 = shalt.err (!%p4080_p1)
}
  0x9e   : > { %s4084_s20 = scalar_lea.vmem %s743_s21, 16  ;;  %s4434_s18 = smov [#allocation15]  }
  0x9f   : > { %p4085_p3 = scmp.ne.s32.totalorder %s743_s21, %s4084_s20  ;;  %s4089_s28 = sshll.u32 %s4434_s18, 4  ;;  %s4090_s28 = int_to_ptr.vmem [resolvable:$false] %s4089_s28 }
  0xa0   : > { %s4091_s2 = scalar_lea.vmem %s4090_s28, 32  ;;  %p4092_p6 = scmp.lt.s32.totalorder %s743_s21, %s4090_s28 }
  0xa1   : > { %p4087_p8 = pnand %p4085_p3, %p4679_p2  ;;  %p4093_p7 = scmp.lt.s32.totalorder %s4091_s2, %s4084_s20 }
  0xa3   : > { %p4088_p4 = pneg %p4087_p8  ;;  %p4094_p11 = por %p4093_p7, %p4092_p6 }
  0xa5   : > { %p4095_p9 = pnand %p4094_p11, %p4088_p4 }
  0xa7   : > { %4098 = shalt.err (!%p4095_p9)
}
  0xa8   : > { %3796 = dma.hbm_to_vmem [thread:$0]  (!%p4662_p13), %s740_s30, 16, %s743_s21, %s4673_s12  }
  0xa9   : > { %s4435_s0 = smov [#allocation6]   ;;  %p5279_p12 = scmp.ne.s32.totalorder %s5270_s4, 0 }
  0xaa   : > { %s566_s10 = sshll.u32 %s4435_s0, 4  ;;  %s567_s10 = int_to_ptr.vmem [resolvable:$true] %s566_s10 }
  0xab   : > { %s4110_s22 = scalar_lea.vmem %s567_s10, 32  ;;  %p4118_p1 = scmp.lt.s32.totalorder %s567_s10, %s567_s10 }
  0xac   : > { %p4111_p10 = scmp.ne.s32.totalorder %s567_s10, %s4110_s22  ;;  %p4119_p3 = scmp.lt.s32.totalorder %s4110_s22, %s4110_s22 }
  0xae   : > { %p4113_p0 = pnand %p4111_p10, %p5279_p12  ;;  %p4120_p8 = por %p4119_p3, %p4118_p1 }
  0xb0   : > { %p4114_p5 = pneg %p4113_p0 }
  0xb2   : > { %p4121_p2 = pnand %p4120_p8, %p4114_p5 }
  0xb4   : > { %4124 = shalt.err (!%p4121_p2)
}
  0xb5   : > { %s4436_s23 = smov 16   ;;  %s4437_s6 = smov 1  }
  0xb6   : > { %p5280_p4 = scmp.ne.s32.totalorder %s5268_s27, 0  ;;  %s5281_s5 = sld [smem:[#allocation39_spill]] }
  0xb7   : > { %s4784_s18 = scalar_lea.hbm %s5221_s13, %s4651_s25  ;;  %s760_s28 = scalar_lea.vmem [#allocation16], %s4648_s26 }
  0xb8   : > { %s767_s2 = sshll.u32 %s760_s28, 4  ;;  %s4438_s0 = smov [#allocation8]   ;;  %s768_s2 = int_to_ptr.vmem [resolvable:$true] %s767_s2 }
  0xb9   : > { %s580_s22 = sshll.u32 %s4438_s0, 4  ;;  %s4125_s7 = scalar_lea.hbm %s4784_s18, 16  ;;  %s581_s22 = int_to_ptr.vmem [resolvable:$true] %s580_s22 }
  0xba   : > { %p4126_p2 = scmp.ne.s32.totalorder %s4784_s18, %s4125_s7  ;;  %p5282_p6 = scmp.ne.s32.totalorder %s5278_s1, 0 }
  0xbb   : > { %p4131_p9 = scmp.lt.s32.totalorder %s4784_s18, %s5221_s13 }
  0xbc   : > { %3765 = dma.hbm_to_vmem [thread:$0]  (!%p5280_p4), %s5281_s5, 32, %s567_s10, [#allocation7], %s4436_s23, %s4436_s23, %s4437_s6  }
  0xbd   : > { %p4128_p7 = pnand %p4126_p2, %p5282_p6  ;;  %s4130_s23 = scalar_lea.hbm %s5221_s13, 32 }
  0xbe   : > { %p4132_p10 = scmp.lt.s32.totalorder %s4130_s23, %s4125_s7 }
  0xbf   : > { %p4129_p11 = pneg %p4128_p7 }
  0xc0   : > { %p4133_p0 = por %p4132_p10, %p4131_p9 }
  0xc2   : > { %p4134_p5 = pnand %p4133_p0, %p4129_p11 }
  0xc4   : > { %4137 = shalt.err (!%p4134_p5)
}
  0xc5   : > { %s4138_s5 = scalar_lea.vmem %s768_s2, 16  ;;  %s4439_s24 = smov [#allocation16]  }
  0xc6   : > { %p4139_p1 = scmp.ne.s32.totalorder %s768_s2, %s4138_s5  ;;  %s4143_s20 = sshll.u32 %s4439_s24, 4  ;;  %s4144_s20 = int_to_ptr.vmem [resolvable:$false] %s4143_s20 }
  0xc7   : > { %s4145_s28 = scalar_lea.vmem %s4144_s20, 32  ;;  %p4146_p2 = scmp.lt.s32.totalorder %s768_s2, %s4144_s20 }
  0xc8   : > { %p4141_p3 = pnand %p4139_p1, %p5282_p6  ;;  %p4147_p7 = scmp.lt.s32.totalorder %s4145_s28, %s4138_s5 }
  0xca   : > { %p4142_p8 = pneg %p4141_p3  ;;  %p4148_p4 = por %p4147_p7, %p4146_p2 }
  0xcc   : > { %p4149_p12 = pnand %p4148_p4, %p4142_p8 }
  0xce   : > { %4152 = shalt.err (!%p4149_p12)
}
  0xcf   : > { %3799 = dma.hbm_to_vmem [thread:$0]  (!%p4662_p13), %s4784_s18, 16, %s768_s2, %s4673_s12  }
  0xd0   : > { %s4164_s7 = scalar_lea.vmem %s581_s22, 16  ;;  %p5283_p9 = scmp.ne.s32.totalorder %s5270_s4, 0 }
  0xd1   : > { %p4165_p11 = scmp.ne.s32.totalorder %s581_s22, %s4164_s7  ;;  %s4171_s0 = scalar_lea.vmem %s581_s22, 32 }
  0xd2   : > { %p4172_p5 = scmp.lt.s32.totalorder %s581_s22, %s581_s22  ;;  %p4173_p1 = scmp.lt.s32.totalorder %s4171_s0, %s4164_s7 }
  0xd3   : > { %p4167_p10 = pnand %p4165_p11, %p5283_p9 }
  0xd4   : > { %p4174_p3 = por %p4173_p1, %p4172_p5 }
  0xd5   : > { %p4168_p0 = pneg %p4167_p10 }
  0xd7   : > { %p4175_p6 = pnand %p4174_p3, %p4168_p0 }
  0xd9   : > { %4178 = shalt.err (!%p4175_p6)
}
  0xda   : > { %p5284_p12 = scmp.ne.s32.totalorder %s5268_s27, 0  ;;  %s5285_s23 = sld [smem:[#allocation40_spill]] }
  0xdb   : > { %s4440_s18 = smov [#allocation9]   ;;  %s4815_s5 = scalar_lea.hbm %s5222_s14, %s4651_s25 }
  0xdc   : > { %s591_s2 = sshll.u32 %s4440_s18, 4  ;;  %s592_s2 = int_to_ptr.vmem [resolvable:$true] %s591_s2 }
  0xdd   : > { %s4190_s24 = scalar_lea.vmem %s592_s2, 16  ;;  %s4197_s20 = scalar_lea.vmem %s592_s2, 32 }
  0xde   : > { %p4191_p4 = scmp.ne.s32.totalorder %s592_s2, %s4190_s24  ;;  %p4198_p2 = scmp.lt.s32.totalorder %s592_s2, %s592_s2 }
  0xdf   : > { %p4199_p7 = scmp.lt.s32.totalorder %s4197_s20, %s4190_s24 }
  0xe0   : > { %3768 = dma.hbm_to_vmem [thread:$0]  (!%p5284_p12), %s5285_s23, 16, %s581_s22, [#allocation7]  }
  0xe1   : > { %p4193_p6 = pnand %p4191_p4, %p5283_p9  ;;  %p4200_p11 = por %p4199_p7, %p4198_p2 }
  0xe3   : > { %p4194_p8 = pneg %p4193_p6 }
  0xe5   : > { %p4201_p10 = pnand %p4200_p11, %p4194_p8 }
  0xe7   : > { %4204 = shalt.err (!%p4201_p10)
}
  0xe8   : > { %s5286_s7 = sld [smem:[#allocation41_spill]]  ;;  %s777_s0 = scalar_lea.vmem [#allocation17], %s4648_s26 }
  0xe9   : > { %s784_s30 = sshll.u32 %s777_s0, 4  ;;  %s4441_s10 = smov [#allocation19]   ;;  %s785_s30 = int_to_ptr.vmem [resolvable:$true] %s784_s30 }
  0xea   : > { %s601_s23 = sshll.u32 %s4441_s10, 4  ;;  %s4205_s18 = scalar_lea.hbm %s4815_s5, 16  ;;  %s602_s23 = int_to_ptr.vmem [resolvable:$true] %s601_s23 }
  0xeb   : > { %p4206_p0 = scmp.ne.s32.totalorder %s4815_s5, %s4205_s18  ;;  %p5287_p5 = scmp.ne.s32.totalorder %s5278_s1, 0 }
  0xec   : > { %s4210_s24 = scalar_lea.hbm %s5222_s14, 32  ;;  %p4211_p4 = scmp.lt.s32.totalorder %s4815_s5, %s5222_s14 }
  0xed   : > { %p4208_p1 = pnand %p4206_p0, %p5287_p5  ;;  %p4212_p6 = scmp.lt.s32.totalorder %s4210_s24, %s4205_s18 }
  0xee   : > { %3771 = dma.hbm_to_vmem [thread:$0]  (!%p5284_p12), %s5286_s7, 16, %s592_s2, [#allocation10]  }
  0xef   : > { %p4209_p3 = pneg %p4208_p1  ;;  %p4213_p8 = por %p4212_p6, %p4211_p4 }
  0xf1   : > { %p4214_p2 = pnand %p4213_p8, %p4209_p3 }
  0xf3   : > { %4217 = shalt.err (!%p4214_p2)
}
  0xf4   : > { %s4218_s2 = scalar_lea.vmem %s785_s30, 16  ;;  %s4442_s28 = smov [#allocation17]  }
  0xf5   : > { %p4219_p7 = scmp.ne.s32.totalorder %s785_s30, %s4218_s2  ;;  %s4223_s7 = sshll.u32 %s4442_s28, 4  ;;  %s4224_s7 = int_to_ptr.vmem [resolvable:$false] %s4223_s7 }
  0xf6   : > { %s4225_s0 = scalar_lea.vmem %s4224_s7, 32  ;;  %p4226_p0 = scmp.lt.s32.totalorder %s785_s30, %s4224_s7 }
  0xf7   : > { %p4221_p11 = pnand %p4219_p7, %p5287_p5  ;;  %p4227_p1 = scmp.lt.s32.totalorder %s4225_s0, %s4218_s2 }
  0xf9   : > { %p4222_p10 = pneg %p4221_p11  ;;  %p4228_p12 = por %p4227_p1, %p4226_p0 }
  0xfb   : > { %p4229_p9 = pnand %p4228_p12, %p4222_p10 }
  0xfd   : > { %4232 = shalt.err (!%p4229_p9)
}
  0xfe   : > { %3802 = dma.hbm_to_vmem [thread:$0]  (!%p4662_p13), %s4815_s5, 16, %s785_s30, %s4673_s12  }
  0xff   : > { %s4244_s10 = scalar_lea.vmem %s602_s23, 512  ;;  %p5288_p4 = scmp.ne.s32.totalorder %s5270_s4, 0 }
 0x100   : > { %p4245_p3 = scmp.ne.s32.totalorder %s602_s23, %s4244_s10  ;;  %p4252_p2 = scmp.lt.s32.totalorder %s602_s23, %s602_s23 }
 0x101   : > { %p4253_p7 = scmp.lt.s32.totalorder %s4244_s10, %s4244_s10 }
 0x102   : > { %p4247_p6 = pnand %p4245_p3, %p5288_p4 }
 0x103   : > { %p4254_p11 = por %p4253_p7, %p4252_p2 }
 0x104   : > { %p4248_p8 = pneg %p4247_p6 }
 0x106   : > { %p4255_p5 = pnand %p4254_p11, %p4248_p8 }
 0x108   : > { %4258 = shalt.err (!%p4255_p5)
}
 0x109   : > { %p5289_p12 = scmp.ne.s32.totalorder %s5268_s27, 0  ;;  %s5290_s18 = smov 8  }
 0x10a   : > { %s5291_s6 = smov 128   ;;  %s4443_s5 = smov [#allocation20]  }
 0x10b   : > { %3774 = dma.hbm_to_vmem [thread:$0]  (!%p5289_p12), %s5224_s16, 512, %s602_s23, [#allocation7], %s5291_s6, %s5291_s6, %s5290_s18  }
 0x10c   : > { %s615_s30 = sshll.u32 %s4443_s5, 4  ;;  %s4444_s20 = smov [#allocation21]   ;;  %s616_s30 = int_to_ptr.vmem [resolvable:$true] %s615_s30 }
 0x10d   : > { %s629_s22 = sshll.u32 %s4444_s20, 4  ;;  %s4270_s2 = scalar_lea.vmem %s616_s30, 16  ;;  %s630_s22 = int_to_ptr.vmem [resolvable:$true] %s629_s22 }
 0x10e   : > { %p4271_p9 = scmp.ne.s32.totalorder %s616_s30, %s4270_s2  ;;  %s4277_s28 = scalar_lea.vmem %s616_s30, 32 }
 0x10f   : > { %p4278_p0 = scmp.lt.s32.totalorder %s616_s30, %s616_s30  ;;  %p4279_p1 = scmp.lt.s32.totalorder %s4277_s28, %s4270_s2 }
 0x110   : > { %p4273_p10 = pnand %p4271_p9, %p5288_p4 }
 0x111   : > { %p4280_p3 = por %p4279_p1, %p4278_p0 }
 0x112   : > { %p4274_p5 = pneg %p4273_p10 }
 0x114   : > { %p4281_p6 = pnand %p4280_p3, %p4274_p5 }
 0x116   : > { %4284 = shalt.err (!%p4281_p6)
}
 0x117   : > { %3777 = dma.hbm_to_vmem [thread:$0]  (!%p5289_p12), %s5225_s17, 16, %s616_s30, [#allocation10]  }
 0x118   : > { %s4296_s0 = scalar_lea.vmem %s630_s22, 16  ;;  %s4303_s10 = scalar_lea.vmem %s630_s22, 32 }
 0x119   : > { %p4297_p8 = scmp.ne.s32.totalorder %s630_s22, %s4296_s0  ;;  %p4304_p11 = scmp.lt.s32.totalorder %s630_s22, %s630_s22 }
 0x11a   : > { %p4305_p9 = scmp.lt.s32.totalorder %s4303_s10, %s4296_s0 }
 0x11b   : > { %p4299_p2 = pnand %p4297_p8, %p5288_p4 }
 0x11c   : > { %p4306_p10 = por %p4305_p9, %p4304_p11 }
 0x11d   : > { %p4300_p7 = pneg %p4299_p2 }
 0x11f   : > { %p4307_p0 = pnand %p4306_p10, %p4300_p7 }
 0x121   : > { %4310 = shalt.err (!%p4307_p0)
}
 0x122   : > { %3780 = dma.hbm_to_vmem [thread:$0]  (!%p5289_p12), %s5227_s19, 16, %s630_s22, [#allocation22]  }
 0x123   : > { %s799_s4 = scalar_lea.hbm %s5223_s15, %s4651_s25  ;;  %s794_s5 = scalar_lea.vmem [#allocation18], %s4648_s26 }
 0x124   : > { %s801_s30 = sshll.u32 %s794_s5, 4  ;;  %s4311_s20 = scalar_lea.hbm %s799_s4, 16  ;;  %s802_s30 = int_to_ptr.vmem [resolvable:$true] %s801_s30 }
 0x125   : > { %p4312_p4 = scmp.ne.s32.totalorder %s799_s4, %s4311_s20  ;;  %p5292_p5 = scmp.ne.s32.totalorder %s5278_s1, 0 }
 0x126   : > { %s4316_s28 = scalar_lea.hbm %s5223_s15, 32  ;;  %p4317_p12 = scmp.lt.s32.totalorder %s799_s4, %s5223_s15 }
 0x127   : > { %p4314_p1 = pnand %p4312_p4, %p5292_p5  ;;  %p4318_p6 = scmp.lt.s32.totalorder %s4316_s28, %s4311_s20 }
 0x129   : > { %p4315_p3 = pneg %p4314_p1  ;;  %p4319_p8 = por %p4318_p6, %p4317_p12 }
 0x12b   : > { %p4320_p2 = pnand %p4319_p8, %p4315_p3 }
 0x12d   : > { %4323 = shalt.err (!%p4320_p2)
}
 0x12e   : > { %s4324_s26 = scalar_lea.vmem %s802_s30, 16  ;;  %s4445_s25 = smov [#allocation18]  }
 0x12f   : > { %p4325_p7 = scmp.ne.s32.totalorder %s802_s30, %s4324_s26  ;;  %s4329_s22 = sshll.u32 %s4445_s25, 4  ;;  %s4330_s22 = int_to_ptr.vmem [resolvable:$false] %s4329_s22 }
 0x130   : > { %s4331_s0 = scalar_lea.vmem %s4330_s22, 32  ;;  %p4332_p10 = scmp.lt.s32.totalorder %s802_s30, %s4330_s22 }
 0x131   : > { %p4327_p11 = pnand %p4325_p7, %p5292_p5  ;;  %p4333_p0 = scmp.lt.s32.totalorder %s4331_s0, %s4324_s26 }
 0x133   : > { %p4328_p9 = pneg %p4327_p11  ;;  %p4334_p4 = por %p4333_p0, %p4332_p10 }
 0x135   : > { %p4335_p1 = pnand %p4334_p4, %p4328_p9 }
 0x137   : > { %4338 = shalt.err (!%p4335_p1)
}
 0x138   : > { %3805 = dma.hbm_to_vmem [thread:$0]  (!%p4662_p13), %s799_s4, 16, %s802_s30, %s4673_s12  }
 0x139   : > { %s5293_s10 = sld [smem:[#allocation34_spill]] }
 0x13f   : > { %p5294_p3 = scmp.ne.s32.totalorder %s5293_s10, 0 }
 0x140   : > { %p5295_p12 = scmp.eq.s32.totalorder (!%p5294_p3), %s4591_s3, 0 }
 0x141   : > { %810 = sbr.rel (%p5294_p3) target bundleno = 5024 (0x13a0), region = 100 }
 0x146   : > { %4380 = dma.done.wait (%p5295_p12), [#allocation4], 256   ;;  %p5296_p5 = pmov %p5295_p12 }
 0x148   : > { %4382 = vsyncadd (%p5296_p5), [#allocation4], 4294967040  ;;  %p5297_p6 = pmov %p5296_p5 }
 0x149   : > { %p5298_p8 = pmov %p5296_p5 }
 0x14a   : > { %4384 = dma.done.wait (%p5297_p6), [#allocation7], 48  }
 0x14b   : > { %4386 = vsyncadd (%p5298_p8), [#allocation7], 4294967248  ;;  %p5299_p2 = pmov %p5296_p5 }
 0x14d   : > { %4388 = dma.done.wait (%p5299_p2), [#allocation10], 16   ;;  %p5300_p13 = pmov %p5299_p2 }
 0x14e   : > { %s5301_s12 = sld [smem:[#allocation32_spill]]  ;;  %s828_s1 = sand.u32 1, %s4591_s3  }
 0x14f   : > { %4390 = vsyncadd (%p5300_p13), [#allocation10], 4294967280  ;;  %s5302_s29 = sld [smem:[#allocation37_spill]]  ;;  %s829_s6 = scalar_lea.sflag [#allocation4], %s828_s1 }
 0x154   : > { %s4900_s18 = sand.u32 1, %s5301_s12  }
 0x155   : > { %s831_s21 = scalar_lea.vmem [#allocation11], %s4900_s18  ;;  %p5303_p7 = scmp.ne.s32.totalorder %s5302_s29, 0 }
 0x157   : > { %4392 = dma.done.wait (%p5303_p7), %s829_s6, 128  }
 0x158   : > { %4394 = vsyncadd (%p5303_p7), %s829_s6, 4294967168  ;;  %p5304_p11 = pmov %p5299_p2 }
 0x159   : > { %p5305_p9 = pmov %p5299_p2 }
 0x15a   : > { %4396 = dma.done.wait (%p5304_p11), [#allocation7], 512  }
 0x15b   : > { %4398 = vsyncadd (%p5305_p9), [#allocation7], 4294966784  ;;  %p5306_p10 = pmov %p5299_p2 }
 0x15c   : > { %p5307_p0 = pmov %p5299_p2 }
 0x15d   : > { %4400 = dma.done.wait (%p5306_p10), [#allocation10], 16  }
 0x15e   : > { %4402 = vsyncadd (%p5307_p0), [#allocation10], 4294967280  ;;  %p5308_p4 = pmov %p5307_p0 }
 0x15f   : > { %p5309_p1 = pmov %p5307_p0 }
 0x160   : > { %4404 = dma.done.wait (%p5308_p4), [#allocation22], 16  }
 0x161   : > { %4406 = vsyncadd (%p5309_p1), [#allocation22], 4294967280  ;;  %p998_p3 = scmp.lt.s32.totalorder %s4591_s3, 1  ;;  %s5310_s22 = sld [smem:[#allocation42_spill]] }
 0x162   : > { %s5311_s29 = sld [smem:[#allocation44_spill]]  ;;  %p5314_p12 = scmp.ne.s32.totalorder %s4591_s3, 0 }
 0x163   : > { %s999_s28 = scalar_select %p998_p3, %s4591_s3, 1 }
 0x164   : > { %s5312_s27 = sld [smem:[#allocation46_spill]] }
 0x165   : > { %s3483_s7 = sshll.u32 %s999_s28, 5  ;;  %s3486_s23 = sshll.u32 %s999_s28, 6 }
 0x166   : > { %s5313_s4 = sld [smem:[#allocation47_spill]] }
 0x167   : > { %s4931_s0 = scalar_lea.vmem %s5310_s22, %s3483_s7 }
 0x168   : > { %s4936_s1 = scalar_lea.vmem %s5311_s29, %s3483_s7  ;;  %1021 = sbr.rel (%p5314_p12) target bundleno = 679 (0x2a7), region = 164 }
 0x16a   : > { %s4941_s20 = scalar_lea.vmem %s5312_s27, %s3483_s7 }
 0x16c   : > { %s4946_s24 = scalar_lea.vmem %s5313_s4, %s3486_s23 }
 0x16d   : > { %v1022_v0 = vld [vmem:[#allocation3] sm:$0xff]  ;;  %vm1026_vm0 = vcmask 261120   ;;  %v1023_v1 = vld [vmem:[#allocation3 + $0x8] sm:$0xff]  ;;  %v3430_v21 = vld [vmem:[#allocation8] ss:$0 sm:$0xff] }
 0x16e   : > { %v1027_v2 = vsel %vm1026_vm0, %v1022_v0, 0.0  ;;  %v1030_v3 = vsel %vm1026_vm0, %v1023_v1, 0.0  ;;  %v3431_v23 = vld [vmem:[#allocation9] ss:$0 sm:$0xff] }
 0x16f   : > { %1028 = vadd.xlane.f32.xlu0 %v1027_v2 }
 0x173   : > { %1031 = vadd.xlane.f32.xlu0 %v1030_v3 }
 0x1f8   : > { %v1029_v4 = vpop.xlane.xlu0 %1028 }
 0x1f9   : > { %v1034_v5 = vmul.f32 0.03125, %v1029_v4 }
 0x1fb   : > { %v1036_v6 = vsub.f32 %v1022_v0, %v1034_v5 }
 0x1fc   : > { %v1032_v7 = vpop.xlane.xlu0 %1031 }
 0x1fd   : > { %v1035_v8 = vmul.f32 0.03125, %v1032_v7  ;;  %v1038_v9 = vmul.f32 %v1036_v6, %v1036_v6 }
 0x1ff   : > { %v1037_v10 = vsub.f32 %v1023_v1, %v1035_v8  ;;  %v1040_v11 = vsel %vm1026_vm0, %v1038_v9, 0.0 }
 0x200   : > { %1041 = vadd.xlane.f32.xlu1 %v1040_v11 }
 0x201   : > { %v1039_v12 = vmul.f32 %v1037_v10, %v1037_v10 }
 0x203   : > { %v1043_v13 = vsel %vm1026_vm0, %v1039_v12, 0.0 }
 0x204   : > { %1044 = vadd.xlane.f32.xlu1 %v1043_v13 }
 0x289   : > { %v1042_v14 = vpop.xlane.xlu1 %1041 }
 0x28a   : > { %v1046_v15 = vmul.f32 0.03125, %v1042_v14 }
 0x28c   : > { %v1048_v16 = vadd.f32 1e-12, %v1046_v15 }
 0x28d   : > { %v1045_v17 = vpop.xlane.xlu1 %1044 }
 0x28e   : > { %3885 = vrsqrt.f32 %v1048_v16  ;;  %v1047_v18 = vmul.f32 0.03125, %v1045_v17 }
 0x290   : > { %v1049_v19 = vadd.f32 1e-12, %v1047_v18 }
 0x292   : > { %3887 = vrsqrt.f32 %v1049_v19 }
 0x29b   : > { %v3886_v20 = vpop.eup %3885 }
 0x29c   : > { %v1052_v22 = vmul.f32 %v3886_v20, %v1036_v6 }
 0x29e   : > { %v1060_v24 = vmul.f32 %v3430_v21, %v1052_v22 }
 0x29f   : > { %v3888_v25 = vpop.eup %3887 }
 0x2a0   : > { %v1068_v26 = vadd.f32 %v3431_v23, %v1060_v24  ;;  %v1053_v27 = vmul.f32 %v3888_v25, %v1037_v10 }
 0x2a2   : > { %1070 = vst.msk [vmem:[#allocation2] sm:$0xff] %vm1026_vm0, %v1068_v26  ;;  %v1061_v28 = vmul.f32 %v3430_v21, %v1053_v27 }
 0x2a4   : > { %v1069_v29 = vadd.f32 %v3431_v23, %v1061_v28 }
 0x2a6   : > { %1071 = vst.msk [vmem:[#allocation2 + $0x8] sm:$0xff] %vm1026_vm0, %v1069_v29 }
 0x2a7 PF: > { %v1077_v30 = vld [vmem:[%s4931_s0 + $0x18] sm:$0xff]  ;;  %v1076_v31 = vld [vmem:[%s4931_s0 + $0x10] sm:$0xff]  ;;  %vm1085_vm1 = vcmask 261120   ;;  %v1075_v33 = vld [vmem:[%s4931_s0 + $0x8] sm:$0xff]  ;;  %v4446_v36 = vmov 0.0   ;;  %vm4447_vm2 = vmmov 0  }
 0x2a8   : > { %3557 = vmatprep.subr.mxu1 %v1077_v30  ;;  %v1074_v34 = vld [vmem:[%s4931_s0] sm:$0xff]  ;;  %3578 = vmatprep.subr.mxu0 %v4446_v36  ;;  %s4448_s4 = smov 96   ;;  %vm1186_vm3 = vcmask 64512   ;;  %s4450_s5 = smov 88   ;;  %vm2533_vm4 = vcmask 195584   ;;  %vm2530_vm5 = vcmask 130048  }
 0x2a9   : > { %v4958_v32 = vld [vmem:[#allocation2] sm:$0xff]  ;;  %3558 = vmatpush3.msra.mxu1 %v1077_v30  ;;  %3580 = vmatprep.mubr.msk.f32.mxu0 %vm4447_vm2, %v4446_v36  ;;  %s4451_s30 = smov 120   ;;  %s4452_s27 = smov 56   ;;  %vm2800_vm6 = vcmask 523264  }
 0x2aa   : > { %3565 = vmatprep.mubr.msk.f32.mxu1 %vm1085_vm1, %v4958_v32  ;;  %3559 = vmatprep.subr.mxu1 %v1076_v31  ;;  %v3432_v38 = vld [vmem:[%s831_s21] ss:$0 sm:$0xff]  ;;  %v5003_v50 = vld [vmem:[#allocation6 + $0x1] ss:$0 sm:$0xff]  ;;  %s4449_s21 = smov 64   ;;  %s4453_s2 = smov 80  }
 0x2ab   : > { %3560 = vmatpush3.msra.mxu1 %v1076_v31  ;;  %v5000_v46 = vld [vmem:[#allocation6] ss:$0 sm:$0xff]  ;;  %s4454_s28 = smov 112   ;;  %s4455_s7 = smov 48  }
 0x2ac   : > { %3561 = vmatprep.subr.mxu1 %v1075_v33  ;;  %s4456_s23 = smov 72   ;;  %s4457_s26 = smov 104  }
 0x2ad   : > { %3562 = vmatpush3.msra.mxu1 %v1075_v33  ;;  %v4964_v35 = vld [vmem:[#allocation2 + $0x8] sm:$0xff]  ;;  %s4458_s25 = smov 40   ;;  %s4459_s22 = smov 8  }
 0x2ae   : > { %3563 = vmatprep.subr.mxu1 %v1074_v34  ;;  %s4460_s0 = smov 16   ;;  %s4461_s10 = smov 24  }
 0x2af   : > { %3564 = vmatpush3.msra.mxu1 %v1074_v34  ;;  %s5315_s12 = scalar_lea.vmem [#allocation12], %s4900_s18  ;;  %s5316_s29 = scalar_lea.vmem [#allocation13], %s4900_s18 }
 0x2b0   : > { %3566 = vmatmul.mubr.msk.f32.vlgmr.msra.gmra.mxu1 %vm1085_vm1, %v4964_v35  ;;  %3568 = vmatprep.subr.mxu1 %v4446_v36  ;;  %s5320_s6 = scalar_lea.vmem [#allocation17], %s4900_s18  ;;  %p3474_p5 = scmp.ne.s32.totalorder %s4591_s3, 1 }
 0x2b1   : > { %3570 = vmatprep.mubr.msk.f32.mxu1 %vm4447_vm2, %v4446_v36 }
 0x370   : > { %v3567_v37 = vpop.f32.mrf.mxu1 }
 0x371   : > { %v4979_v41 = vadd.f32 %v3567_v37, %v3432_v38 }
 0x372   : > { %v1158_v39 = vpop.f32.mrf.mxu1 }
 0x373   : > { %v4976_v40 = vadd.f32 %v3432_v38, %v1158_v39  ;;  %v4993_v45 = vmul.f32 0.35355338, %v4979_v41 }
 0x375   : > { %1184 = vrot.lane.b32.xlu0 %v4976_v40, %s4448_s4  ;;  %v4985_v43 = vmul.f32 0.35355338, %v4976_v40 }
 0x379   : > { %1263 = vrot.lane.b32.xlu0 %v4979_v41, %s4448_s4  ;;  %s5321_s4 = scalar_lea.vmem [#allocation18], %s4900_s18 }
 0x3e7   : > { %v1185_v42 = vpop.permute.xlu0 %1184 }
 0x3e8   : > { %3569 = vmatpush3.xpose.msk.msra.mxu1 %vm1186_vm3, %v1185_v42 }
 0x3e9   : > { %3573 = vmatprep.subr.mxu1 %v4446_v36 }
 0x3eb   : > { %v1264_v44 = vpop.permute.xlu0 %1263  ;;  %3571 = vmatmul.mubr.msk.f32.vlgmr.msra.gmra.mxu1 %vm1186_vm3, %v4985_v43 }
 0x3ec   : > { %3574 = vmatpush3.xpose.msk.msra.mxu1 %vm1186_vm3, %v1264_v44  ;;  %3575 = vmatprep.mubr.msk.f32.mxu1 %vm4447_vm2, %v4446_v36 }
 0x3ed   : > { %3583 = vmatprep.subr.mxu1 %v4446_v36 }
 0x3ef   : > { %3576 = vmatmul.mubr.msk.f32.vlgmr.msra.gmra.mxu1 %vm1186_vm3, %v4993_v45 }
 0x3f0   : > { %3585 = vmatprep.mubr.msk.f32.mxu1 %vm4447_vm2, %v4446_v36 }
 0x4ab   : > { %v1258_v47 = vpop.f32.mrf.mxu1 }
 0x4ac   : > { %v1259_v48 = vadd.f32 %v5000_v46, %v1258_v47 }
 0x4ad   : > { %v3572_v49 = vpop.f32.mrf.mxu1 }
 0x4ae   : > { %v1340_v51 = vsel %vm1186_vm3, %v1259_v48, -inf }
 0x4af   : > { %1341 = vmax.xlane.f32.xlu1 %v1340_v51  ;;  %v1336_v52 = vpop.f32.mrf.mxu1 }
 0x4b0   : > { %v1337_v53 = vadd.f32 %v5003_v50, %v1336_v52 }
 0x4b1   : > { %v3577_v54 = vpop.f32.mrf.mxu1 }
 0x4b2   : > { %v1343_v55 = vsel %vm1186_vm3, %v1337_v53, -inf }
 0x4b3   : > { %1344 = vmax.xlane.f32.xlu1 %v1343_v55 }
 0x4c4   : > { %1362 = vrot.lane.b32.xlu1 %v4976_v40, %s4449_s21 }
 0x4c8   : > { %1438 = vrot.lane.b32.xlu1 %v4979_v41, %s4449_s21 }
 0x4cc   : > { %1516 = vrot.lane.b32.xlu1 %v4976_v40, %s4450_s5 }
 0x4d0   : > { %1594 = vrot.lane.b32.xlu1 %v4979_v41, %s4450_s5  ;;  %s5322_s5 = sld [smem:[#allocation48_spill]] (!%p3474_p5) }
 0x538   : > { %v1342_v56 = vpop.xlane.xlu1 %1341 }
 0x539   : > { %v1346_v57 = vsub.f32 %v1259_v48, %v1342_v56 }
 0x53b   : > { %v1348_v58 = vmul.f32 1.442695, %v1346_v57 }
 0x53c   : > { %v1345_v59 = vpop.xlane.xlu1 %1344 }
 0x53d   : > { %3889 = vpow2.f32 %v1348_v58  ;;  %v1347_v60 = vsub.f32 %v1337_v53, %v1345_v59 }
 0x53f   : > { %v1350_v61 = vmul.f32 1.442695, %v1347_v60 }
 0x540   : > { %v1363_v62 = vpop.permute.xlu1 %1362 }
 0x541   : > { %3891 = vpow2.f32 %v1350_v61  ;;  %3579 = vmatpush3.msra.mxu0 %v1363_v62 }
 0x542   : > { %3588 = vmatprep.subr.mxu0 %v4446_v36 }
 0x544   : > { %v1439_v63 = vpop.permute.xlu1 %1438 }
 0x545   : > { %3584 = vmatpush3.msra.mxu1 %v1439_v63 }
 0x546   : > { %3593 = vmatprep.subr.mxu1 %v4446_v36 }
 0x548   : > { %v1517_v4 = vpop.permute.xlu1 %1516 }
 0x54a   : > { %v3890_v0 = vpop.eup %3889 }
 0x54b   : > { %v1352_v1 = vsel %vm1186_vm3, %v3890_v0, 0.0 }
 0x54c   : > { %1353 = vadd.xlane.f32.xlu0 %v1352_v1  ;;  %v1595_v5 = vpop.permute.xlu1 %1594 }
 0x54e   : > { %v3892_v2 = vpop.eup %3891 }
 0x54f   : > { %v1355_v3 = vsel %vm1186_vm3, %v3892_v2, 0.0 }
 0x550   : > { %1356 = vadd.xlane.f32.xlu1 %v1355_v3 }
 0x561   : > { %1592 = vrot.lane.b32.xlu1 %v4993_v45, %s4451_s30 }
 0x562   : > { %1514 = vrot.lane.b32.xlu0 %v4985_v43, %s4451_s30 }
 0x5d5   : > { %v1354_v6 = vpop.xlane.xlu0 %1353 }
 0x5d6   : > { %3893 = vrcp.f32 %v1354_v6 }
 0x5d9   : > { %v1357_v7 = vpop.xlane.xlu1 %1356  ;;  %v1515_v12 = vpop.permute.xlu0 %1514 }
 0x5da   : > { %3895 = vrcp.f32 %v1357_v7 }
 0x5dd   : > { %v1593_v13 = vpop.permute.xlu1 %1592 }
 0x5e3   : > { %v3894_v8 = vpop.eup %3893 }
 0x5e4   : > { %v1360_v9 = vmul.f32 %v3894_v8, %v3890_v0 }
 0x5e6   : > { %3581 = vmatmul.mubr.msk.f32.vlgmr.msra.gmra.mxu0 %vm1186_vm3, %v1360_v9 }
 0x5e7   : > { %v3896_v10 = vpop.eup %3895  ;;  %3589 = vmatpush3.xpose.msk.msra.mxu0 %vm1186_vm3, %v1517_v4  ;;  %3590 = vmatprep.mubr.msk.f32.mxu0 %vm4447_vm2, %v4446_v36 }
 0x5e8   : > { %v1361_v11 = vmul.f32 %v3896_v10, %v3892_v2  ;;  %3598 = vmatprep.subr.mxu0 %v4446_v36 }
 0x5ea   : > { %3586 = vmatmul.mubr.msk.f32.vlgmr.msra.gmra.mxu1 %vm1186_vm3, %v1361_v11  ;;  %3591 = vmatmul.mubr.msk.f32.vlgmr.msra.gmra.mxu0 %vm1186_vm3, %v1515_v12 }
 0x5eb   : > { %3594 = vmatpush3.xpose.msk.msra.mxu1 %vm1186_vm3, %v1595_v5  ;;  %3595 = vmatprep.mubr.msk.f32.mxu1 %vm4447_vm2, %v4446_v36 }
 0x5ec   : > { %3603 = vmatprep.subr.mxu1 %v4446_v36  ;;  %3600 = vmatprep.mubr.msk.f32.mxu0 %vm4447_vm2, %v4446_v36 }
 0x5ee   : > { %3596 = vmatmul.mubr.msk.f32.vlgmr.msra.gmra.mxu1 %vm1186_vm3, %v1593_v13 }
 0x5ef   : > { %3605 = vmatprep.mubr.msk.f32.mxu1 %vm4447_vm2, %v4446_v36 }
 0x6a6   : > { %v5034_v14 = vpop.f32.mrf.mxu0 }
 0x6a8   : > { %v3582_v15 = vpop.f32.mrf.mxu0 }
 0x6aa   : > { %v5036_v16 = vpop.f32.mrf.mxu1  ;;  %v1588_v17 = vpop.f32.mrf.mxu0 }
 0x6ab   : > { %v1589_v18 = vadd.f32 %v5000_v46, %v1588_v17 }
 0x6ac   : > { %v3587_v19 = vpop.f32.mrf.mxu1  ;;  %v3592_v20 = vpop.f32.mrf.mxu0 }
 0x6ad   : > { %v1670_v21 = vsel %vm1186_vm3, %v1589_v18, -inf }
 0x6ae   : > { %1671 = vmax.xlane.f32.xlu1 %v1670_v21  ;;  %v1666_v22 = vpop.f32.mrf.mxu1 }
 0x6af   : > { %v1667_v23 = vadd.f32 %v5003_v50, %v1666_v22 }
 0x6b0   : > { %v3597_v24 = vpop.f32.mrf.mxu1 }
 0x6b1   : > { %v1673_v25 = vsel %vm1186_vm3, %v1667_v23, -inf }
 0x6b2   : > { %1674 = vmax.xlane.f32.xlu0 %v1673_v25 }
 0x6bf   : > { %1692 = vrot.lane.b32.xlu1 %v4976_v40, %s4452_s27 }
 0x6c3   : > { %1846 = vrot.lane.b32.xlu1 %v4976_v40, %s4453_s2 }
 0x6c7   : > { %1924 = vrot.lane.b32.xlu1 %v4979_v41, %s4453_s2 }
 0x6c8   : > { %1768 = vrot.lane.b32.xlu0 %v4979_v41, %s4452_s27 }
 0x6cc   : > { %1844 = vrot.lane.b32.xlu0 %v4985_v43, %s4454_s28 }
 0x737   : > { %v1672_v26 = vpop.xlane.xlu1 %1671 }
 0x738   : > { %v1676_v27 = vsub.f32 %v1589_v18, %v1672_v26 }
 0x73a   : > { %v1678_v28 = vmul.f32 1.442695, %v1676_v27 }
 0x73b   : > { %v1693_v29 = vpop.permute.xlu1 %1692  ;;  %v1675_v30 = vpop.xlane.xlu0 %1674 }
 0x73c   : > { %3897 = vpow2.f32 %v1678_v28  ;;  %v1677_v31 = vsub.f32 %v1667_v23, %v1675_v30  ;;  %3599 = vmatpush3.msra.mxu0 %v1693_v29 }
 0x73d   : > { %3608 = vmatprep.subr.mxu0 %v4446_v36 }
 0x73e   : > { %v1680_v33 = vmul.f32 1.442695, %v1677_v31 }
 0x73f   : > { %v1769_v34 = vpop.permute.xlu0 %1768  ;;  %v1847_v44 = vpop.permute.xlu1 %1846 }
 0x740   : > { %3899 = vpow2.f32 %v1680_v33  ;;  %3604 = vmatpush3.msra.mxu1 %v1769_v34 }
 0x741   : > { %3613 = vmatprep.subr.mxu1 %v4446_v36 }
 0x743   : > { %v1925_v47 = vpop.permute.xlu1 %1924  ;;  %v1845_v55 = vpop.permute.xlu0 %1844 }
 0x749   : > { %v3898_v37 = vpop.eup %3897 }
 0x74a   : > { %v1682_v38 = vsel %vm1186_vm3, %v3898_v37, 0.0 }
 0x74b   : > { %1683 = vadd.xlane.f32.xlu1 %v1682_v38 }
 0x74d   : > { %v3900_v39 = vpop.eup %3899 }
 0x74e   : > { %v1685_v42 = vsel %vm1186_vm3, %v3900_v39, 0.0 }
 0x74f   : > { %1686 = vadd.xlane.f32.xlu1 %v1685_v42 }
 0x760   : > { %1922 = vrot.lane.b32.xlu1 %v4993_v45, %s4454_s28 }
 0x7d4   : > { %v1684_v48 = vpop.xlane.xlu1 %1683 }
 0x7d5   : > { %3901 = vrcp.f32 %v1684_v48 }
 0x7d8   : > { %v1687_v49 = vpop.xlane.xlu1 %1686 }
 0x7d9   : > { %3903 = vrcp.f32 %v1687_v49 }
 0x7dc   : > { %v1923_v56 = vpop.permute.xlu1 %1922 }
 0x7e2   : > { %v3902_v51 = vpop.eup %3901 }
 0x7e3   : > { %v1690_v52 = vmul.f32 %v3902_v51, %v3898_v37 }
 0x7e5   : > { %3601 = vmatmul.mubr.msk.f32.vlgmr.msra.gmra.mxu0 %vm1186_vm3, %v1690_v52 }
 0x7e6   : > { %v3904_v53 = vpop.eup %3903  ;;  %3609 = vmatpush3.xpose.msk.msra.mxu0 %vm1186_vm3, %v1847_v44  ;;  %3610 = vmatprep.mubr.msk.f32.mxu0 %vm4447_vm2, %v4446_v36 }
 0x7e7   : > { %v1691_v54 = vmul.f32 %v3904_v53, %v3900_v39  ;;  %3618 = vmatprep.subr.mxu0 %v4446_v36 }
 0x7e9   : > { %3606 = vmatmul.mubr.msk.f32.vlgmr.msra.gmra.mxu1 %vm1186_vm3, %v1691_v54  ;;  %3611 = vmatmul.mubr.msk.f32.vlgmr.msra.gmra.mxu0 %vm1186_vm3, %v1845_v55 }
 0x7ea   : > { %3614 = vmatpush3.xpose.msk.msra.mxu1 %vm1186_vm3, %v1925_v47  ;;  %3615 = vmatprep.mubr.msk.f32.mxu1 %vm4447_vm2, %v4446_v36 }
 0x7eb   : > { %3623 = vmatprep.subr.mxu1 %v4446_v36  ;;  %3620 = vmatprep.mubr.msk.f32.mxu0 %vm4447_vm2, %v4446_v36 }
 0x7ed   : > { %3616 = vmatmul.mubr.msk.f32.vlgmr.msra.gmra.mxu1 %vm1186_vm3, %v1923_v56 }
 0x7ee   : > { %3625 = vmatprep.mubr.msk.f32.mxu1 %vm4447_vm2, %v4446_v36 }
 0x8a5   : > { %v5068_v57 = vpop.f32.mrf.mxu0 }
 0x8a7   : > { %v3602_v58 = vpop.f32.mrf.mxu0 }
 0x8a9   : > { %v5070_v59 = vpop.f32.mrf.mxu1  ;;  %v1918_v60 = vpop.f32.mrf.mxu0 }
 0x8aa   : > { %v1919_v61 = vadd.f32 %v5000_v46, %v1918_v60 }
 0x8ab   : > { %v3607_v62 = vpop.f32.mrf.mxu1  ;;  %v3612_v63 = vpop.f32.mrf.mxu0 }
 0x8ac   : > { %v2000_v0 = vsel %vm1186_vm3, %v1919_v61, -inf  ;;  %v2539_v62 = vld [vmem:[%s4936_s1 + $0x18] sm:$0xff]  ;;  %v2538_v63 = vld [vmem:[%s4936_s1 + $0x10] sm:$0xff] }
 0x8ad   : > { %2001 = vmax.xlane.f32.xlu0 %v2000_v0  ;;  %v1996_v1 = vpop.f32.mrf.mxu1  ;;  %v2536_v0 = vld [vmem:[%s4936_s1] sm:$0xff] }
 0x8ae   : > { %v1997_v2 = vadd.f32 %v5003_v50, %v1996_v1 }
 0x8af   : > { %v3617_v3 = vpop.f32.mrf.mxu1 }
 0x8b0   : > { %v2003_v4 = vsel %vm1186_vm3, %v1997_v2, -inf }
 0x8b1   : > { %2004 = vmax.xlane.f32.xlu1 %v2003_v4 }
 0x8c2   : > { %2022 = vrot.lane.b32.xlu1 %v4976_v40, %s4455_s7 }
 0x8c3   : > { %2098 = vrot.lane.b32.xlu0 %v4979_v41, %s4455_s7 }
 0x8c6   : > { %2176 = vrot.lane.b32.xlu1 %v4976_v40, %s4456_s23 }
 0x8ca   : > { %2254 = vrot.lane.b32.xlu1 %v4979_v41, %s4456_s23 }
 0x8ce   : > { %2252 = vrot.lane.b32.xlu1 %v4993_v45, %s4457_s26 }
 0x936   : > { %v2002_v5 = vpop.xlane.xlu0 %2001 }
 0x937   : > { %v2006_v6 = vsub.f32 %v1919_v61, %v2002_v5 }
 0x939   : > { %v2008_v7 = vmul.f32 1.442695, %v2006_v6 }
 0x93a   : > { %v2099_v8 = vpop.permute.xlu0 %2098  ;;  %v2005_v9 = vpop.xlane.xlu1 %2004 }
 0x93b   : > { %3905 = vpow2.f32 %v2008_v7  ;;  %v2007_v10 = vsub.f32 %v1997_v2, %v2005_v9  ;;  %3624 = vmatpush3.msra.mxu1 %v2099_v8 }
 0x93c   : > { %3633 = vmatprep.subr.mxu1 %v4446_v36 }
 0x93d   : > { %v2010_v11 = vmul.f32 1.442695, %v2007_v10 }
 0x93e   : > { %v2023_v12 = vpop.permute.xlu1 %2022 }
 0x93f   : > { %3907 = vpow2.f32 %v2010_v11  ;;  %3619 = vmatpush3.msra.mxu0 %v2023_v12 }
 0x940   : > { %3628 = vmatprep.subr.mxu0 %v4446_v36 }
 0x942   : > { %v2177_v20 = vpop.permute.xlu1 %2176 }
 0x946   : > { %v2255_v24 = vpop.permute.xlu1 %2254 }
 0x948   : > { %v3906_v13 = vpop.eup %3905 }
 0x949   : > { %v2012_v15 = vsel %vm1186_vm3, %v3906_v13, 0.0 }
 0x94a   : > { %2013 = vadd.xlane.f32.xlu0 %v2012_v15  ;;  %v2253_v26 = vpop.permute.xlu1 %2252 }
 0x94c   : > { %v3908_v45 = vpop.eup %3907 }
 0x94d   : > { %v2015_v17 = vsel %vm1186_vm3, %v3908_v45, 0.0 }
 0x94e   : > { %2016 = vadd.xlane.f32.xlu0 %v2015_v17 }
 0x964   : > { %2174 = vrot.lane.b32.xlu0 %v4985_v43, %s4457_s26 }
 0x9d3   : > { %v2014_v18 = vpop.xlane.xlu0 %2013 }
 0x9d4   : > { %3909 = vrcp.f32 %v2014_v18  ;;  %v3461_v18 = vld [vmem:[%s5315_s12] ss:$0 sm:$0xff] }
 0x9d7   : > { %v2017_v19 = vpop.xlane.xlu0 %2016 }
 0x9d8   : > { %3911 = vrcp.f32 %v2017_v19 }
 0x9db   : > { %v2175_v43 = vpop.permute.xlu0 %2174 }
 0x9e1   : > { %v3910_v21 = vpop.eup %3909 }
 0x9e2   : > { %v2020_v22 = vmul.f32 %v3910_v21, %v3906_v13 }
 0x9e4   : > { %3621 = vmatmul.mubr.msk.f32.vlgmr.msra.gmra.mxu0 %vm1186_vm3, %v2020_v22 }
 0x9e5   : > { %v3912_v23 = vpop.eup %3911  ;;  %3629 = vmatpush3.xpose.msk.msra.mxu0 %vm1186_vm3, %v2177_v20  ;;  %3630 = vmatprep.mubr.msk.f32.mxu0 %vm4447_vm2, %v4446_v36 }
 0x9e6   : > { %v2021_v25 = vmul.f32 %v3912_v23, %v3908_v45  ;;  %3638 = vmatprep.subr.mxu0 %v4446_v36 }
 0x9e8   : > { %3626 = vmatmul.mubr.msk.f32.vlgmr.msra.gmra.mxu1 %vm1186_vm3, %v2021_v25  ;;  %3631 = vmatmul.mubr.msk.f32.vlgmr.msra.gmra.mxu0 %vm1186_vm3, %v2175_v43 }
 0x9e9   : > { %3634 = vmatpush3.xpose.msk.msra.mxu1 %vm1186_vm3, %v2255_v24  ;;  %3635 = vmatprep.mubr.msk.f32.mxu1 %vm4447_vm2, %v4446_v36 }
 0x9ea   : > { %3643 = vmatprep.subr.mxu1 %v4446_v36  ;;  %3640 = vmatprep.mubr.msk.f32.mxu0 %vm4447_vm2, %v4446_v36 }
 0x9ec   : > { %3636 = vmatmul.mubr.msk.f32.vlgmr.msra.gmra.mxu1 %vm1186_vm3, %v2253_v26 }
 0x9ed   : > { %3645 = vmatprep.mubr.msk.f32.mxu1 %vm4447_vm2, %v4446_v36 }
 0xaa4   : > { %v2094_v27 = vpop.f32.mrf.mxu0 }
 0xaa6   : > { %v3622_v28 = vpop.f32.mrf.mxu0 }
 0xaa8   : > { %v2170_v29 = vpop.f32.mrf.mxu1  ;;  %v2248_v30 = vpop.f32.mrf.mxu0 }
 0xaa9   : > { %v2249_v31 = vadd.f32 %v5000_v46, %v2248_v30 }
 0xaaa   : > { %v3627_v33 = vpop.f32.mrf.mxu1  ;;  %v3632_v34 = vpop.f32.mrf.mxu0 }
 0xaab   : > { %v2330_v37 = vsel %vm1186_vm3, %v2249_v31, -inf  ;;  %v2678_v33 = vld [vmem:[%s4941_s20 + $0x18] sm:$0xff]  ;;  %v2677_v34 = vld [vmem:[%s4941_s20 + $0x10] sm:$0xff] }
 0xaac   : > { %2331 = vmax.xlane.f32.xlu0 %v2330_v37  ;;  %v2326_v38 = vpop.f32.mrf.mxu1  ;;  %v2676_v37 = vld [vmem:[%s4941_s20 + $0x8] sm:$0xff] }
 0xaad   : > { %v2327_v39 = vadd.f32 %v5003_v50, %v2326_v38  ;;  %v2675_v38 = vld [vmem:[%s4941_s20] sm:$0xff]  ;;  %s5318_s20 = scalar_lea.vmem [#allocation15], %s4900_s18 }
 0xaae   : > { %v3637_v42 = vpop.f32.mrf.mxu1 }
 0xaaf   : > { %v2333_v44 = vsel %vm1186_vm3, %v2327_v39, -inf }
 0xab0   : > { %2334 = vmax.xlane.f32.xlu1 %v2333_v44 }
 0xac1   : > { %2352 = vrot.lane.b32.xlu1 %v4976_v40, %s4458_s25 }
 0xac5   : > { %2506 = vrot.lane.b32.xlu1 %v5068_v57, %s4459_s22 }
 0xac9   : > { %2508 = vrot.lane.b32.xlu1 %v5070_v59, %s4459_s22 }
 0xacd   : > { %2516 = vrot.lane.b32.xlu1 %v2170_v29, %s4460_s0 }
 0xb35   : > { %v2332_v36 = vpop.xlane.xlu0 %2331 }
 0xb36   : > { %v2336_v46 = vsub.f32 %v2249_v31, %v2332_v36 }
 0xb38   : > { %v2338_v47 = vmul.f32 1.442695, %v2336_v46 }
 0xb39   : > { %v2335_v48 = vpop.xlane.xlu1 %2334 }
 0xb3a   : > { %3913 = vpow2.f32 %v2338_v47  ;;  %v2337_v50 = vsub.f32 %v2327_v39, %v2335_v48 }
 0xb3c   : > { %v2340_v49 = vmul.f32 1.442695, %v2337_v50  ;;  %v3464_v50 = vld [vmem:[%s5316_s29] ss:$0 sm:$0xff] }
 0xb3d   : > { %v2353_v51 = vpop.permute.xlu1 %2352 }
 0xb3e   : > { %3915 = vpow2.f32 %v2340_v49  ;;  %3639 = vmatpush3.msra.mxu0 %v2353_v51 }
 0xb3f   : > { %3648 = vmatprep.subr.mxu0 %v2539_v62 }
 0xb41   : > { %v2507_v5 = vpop.permute.xlu1 %2506 }
 0xb42   : > { %v2528_v8 = vsel %vm1186_vm3, %v5034_v14, %v2507_v5 }
 0xb45   : > { %v2509_v6 = vpop.permute.xlu1 %2508 }
 0xb46   : > { %v2529_v13 = vsel %vm1186_vm3, %v5036_v16, %v2509_v6 }
 0xb47   : > { %v3914_v52 = vpop.eup %3913 }
 0xb48   : > { %v2342_v40 = vsel %vm1186_vm3, %v3914_v52, 0.0 }
 0xb49   : > { %2343 = vadd.xlane.f32.xlu0 %v2342_v40  ;;  %v2517_v9 = vpop.permute.xlu1 %2516 }
 0xb4a   : > { %v2532_v15 = vsel %vm2530_vm5, %v2529_v13, %v2517_v9 }
 0xb4b   : > { %v3916_v53 = vpop.eup %3915 }
 0xb4c   : > { %v2345_v54 = vsel %vm1186_vm3, %v3916_v53, 0.0 }
 0xb4d   : > { %2346 = vadd.xlane.f32.xlu0 %v2345_v54 }
 0xb63   : > { %2428 = vrot.lane.b32.xlu0 %v4979_v41, %s4458_s25  ;;  %v2537_v41 = vld [vmem:[%s4936_s1 + $0x8] sm:$0xff]  ;;  %s5317_s1 = scalar_lea.vmem [#allocation14], %s4900_s18 }
 0xb64   : > { %v3465_v51 = vld [vmem:[%s5317_s1] ss:$0 sm:$0xff] }
 0xb67   : > { %2514 = vrot.lane.b32.xlu0 %v2094_v27, %s4460_s0 }
 0xbd2   : > { %v2344_v55 = vpop.xlane.xlu0 %2343 }
 0xbd3   : > { %3917 = vrcp.f32 %v2344_v55 }
 0xbd6   : > { %v2347_v56 = vpop.xlane.xlu0 %2346 }
 0xbd7   : > { %3919 = vrcp.f32 %v2347_v56 }
 0xbda   : > { %v2429_v57 = vpop.permute.xlu0 %2428 }
 0xbdb   : > { %3644 = vmatpush3.msra.mxu1 %v2429_v57  ;;  %v2792_v57 = vld [vmem:[%s4946_s24 + $0x38] sm:$0xff] }
 0xbdc   : > { %3659 = vmatprep.subr.mxu1 %v2678_v33 }
 0xbde   : > { %v2515_v7 = vpop.permute.xlu0 %2514 }
 0xbdf   : > { %v2531_v10 = vsel %vm2530_vm5, %v2528_v8, %v2515_v7 }
 0xbe0   : > { %v3918_v58 = vpop.eup %3917 }
 0xbe1   : > { %v2350_v59 = vmul.f32 %v3918_v58, %v3914_v52  ;;  %v2791_v58 = vld [vmem:[%s4946_s24 + $0x30] sm:$0xff] }
 0xbe3   : > { %3641 = vmatmul.mubr.msk.f32.vlgmr.msra.gmra.mxu0 %vm1186_vm3, %v2350_v59  ;;  %v2790_v59 = vld [vmem:[%s4946_s24 + $0x28] sm:$0xff] }
 0xbe4   : > { %v3920_v60 = vpop.eup %3919  ;;  %3649 = vmatpush3.msra.mxu0 %v2539_v62  ;;  %v2787_v62 = vld [vmem:[%s4946_s24 + $0x10] sm:$0xff] }
 0xbe5   : > { %v2351_v61 = vmul.f32 %v3920_v60, %v3916_v53  ;;  %3650 = vmatprep.subr.mxu0 %v2538_v63  ;;  %v2789_v60 = vld [vmem:[%s4946_s24 + $0x20] sm:$0xff] }
 0xbe6   : > { %3651 = vmatpush3.msra.mxu0 %v2538_v63  ;;  %v2786_v63 = vld [vmem:[%s4946_s24 + $0x8] sm:$0xff] }
 0xbe7   : > { %3646 = vmatmul.mubr.msk.f32.vlgmr.msra.gmra.mxu1 %vm1186_vm3, %v2351_v61  ;;  %3652 = vmatprep.subr.mxu0 %v2537_v41  ;;  %v2788_v61 = vld [vmem:[%s4946_s24 + $0x18] sm:$0xff] }
 0xbe8   : > { %3653 = vmatpush3.msra.mxu0 %v2537_v41  ;;  %3660 = vmatpush3.msra.mxu1 %v2678_v33  ;;  %v2785_v41 = vld [vmem:[%s4946_s24] sm:$0xff]  ;;  %s5319_s24 = scalar_lea.vmem [#allocation16], %s4900_s18 }
 0xbe9   : > { %3654 = vmatprep.subr.mxu0 %v2536_v0  ;;  %3661 = vmatprep.subr.mxu1 %v2677_v34 }
 0xbea   : > { %3655 = vmatpush3.msra.mxu0 %v2536_v0  ;;  %3662 = vmatpush3.msra.mxu1 %v2677_v34  ;;  %v3466_v0 = vld [vmem:[%s5318_s20] ss:$0 sm:$0xff] }
 0xbeb   : > { %3663 = vmatprep.subr.mxu1 %v2676_v37  ;;  %3670 = vmatprep.subr.mxu0 %v2792_v57 }
 0xbec   : > { %3664 = vmatpush3.msra.mxu1 %v2676_v37 }
 0xbed   : > { %3665 = vmatprep.subr.mxu1 %v2675_v38 }
 0xbee   : > { %3666 = vmatpush3.msra.mxu1 %v2675_v38 }
 0xca3   : > { %v2424_v1 = vpop.f32.mrf.mxu0 }
 0xca4   : > { %2522 = vrot.lane.b32.xlu0 %v2424_v1, %s4461_s10 }
 0xca5   : > { %v3642_v2 = vpop.f32.mrf.mxu0 }
 0xca7   : > { %v2500_v3 = vpop.f32.mrf.mxu1 }
 0xca8   : > { %2524 = vrot.lane.b32.xlu1 %v2500_v3, %s4461_s10 }
 0xca9   : > { %v3647_v4 = vpop.f32.mrf.mxu1 }
 0xd16   : > { %v2523_v11 = vpop.permute.xlu0 %2522 }
 0xd17   : > { %v2534_v12 = vsel %vm2533_vm4, %v2531_v10, %v2523_v11 }
 0xd18   : > { %3656 = vmatprep.mubr.msk.f32.mxu0 %vm1085_vm1, %v2534_v12 }
 0xd1a   : > { %v2525_v45 = vpop.permute.xlu1 %2524 }
 0xd1b   : > { %v2535_v17 = vsel %vm2533_vm4, %v2532_v15, %v2525_v45 }
 0xd1c   : > { %3657 = vmatmul.mubr.msk.f32.vlgmr.msra.gmra.mxu0 %vm1085_vm1, %v2535_v17 }
 0xd1d   : > { %3671 = vmatpush3.msra.mxu0 %v2792_v57 }
 0xd1e   : > { %3672 = vmatprep.subr.mxu0 %v2791_v58 }
 0xd1f   : > { %3673 = vmatpush3.msra.mxu0 %v2791_v58 }
 0xd20   : > { %3674 = vmatprep.subr.mxu0 %v2790_v59 }
 0xd21   : > { %3675 = vmatpush3.msra.mxu0 %v2790_v59 }
 0xd22   : > { %3676 = vmatprep.subr.mxu0 %v2789_v60 }
 0xd23   : > { %3677 = vmatpush3.msra.mxu0 %v2789_v60 }
 0xd24   : > { %3678 = vmatprep.subr.mxu0 %v2788_v61 }
 0xd25   : > { %3679 = vmatpush3.msra.mxu0 %v2788_v61 }
 0xd26   : > { %3680 = vmatprep.subr.mxu0 %v2787_v62 }
 0xd27   : > { %3681 = vmatpush3.msra.mxu0 %v2787_v62 }
 0xd28   : > { %3682 = vmatprep.subr.mxu0 %v2786_v63 }
 0xd29   : > { %3683 = vmatpush3.msra.mxu0 %v2786_v63 }
 0xd2a   : > { %3684 = vmatprep.subr.mxu0 %v2785_v41 }
 0xd2b   : > { %3685 = vmatpush3.msra.mxu0 %v2785_v41 }
 0xddc   : > { %v3658_v19 = vpop.f32.mrf.mxu0 }
 0xddd   : > { %v2625_v20 = vadd.f32 %v3658_v19, %v3461_v18 }
 0xdde   : > { %v2619_v14 = vpop.f32.mrf.mxu0 }
 0xddf   : > { %v2620_v21 = vadd.f32 %v3461_v18, %v2619_v14  ;;  %v2629_v22 = vadd.f32 %v2625_v20, %v4964_v35 }
 0xde1   : > { %v2635_v23 = vsel %vm1085_vm1, %v2629_v22, 0.0  ;;  %v2628_v24 = vadd.f32 %v2620_v21, %v4958_v32 }
 0xde2   : > { %2636 = vadd.xlane.f32.xlu1 %v2635_v23  ;;  %v3469_v23 = vld [vmem:[%s5319_s24] ss:$0 sm:$0xff] }
 0xde3   : > { %v2632_v16 = vsel %vm1085_vm1, %v2628_v24, 0.0 }
 0xde4   : > { %2633 = vadd.xlane.f32.xlu0 %v2632_v16 }
 0xe6b   : > { %v2637_v25 = vpop.xlane.xlu1 %2636 }
 0xe6c   : > { %v2640_v43 = vmul.f32 0.03125, %v2637_v25 }
 0xe6d   : > { %v2634_v26 = vpop.xlane.xlu0 %2633 }
 0xe6e   : > { %v2639_v27 = vmul.f32 0.03125, %v2634_v26  ;;  %v2642_v28 = vsub.f32 %v2629_v22, %v2640_v43 }
 0xe70   : > { %v2641_v29 = vsub.f32 %v2628_v24, %v2639_v27  ;;  %v2644_v31 = vmul.f32 %v2642_v28, %v2642_v28 }
 0xe72   : > { %v2643_v30 = vmul.f32 %v2641_v29, %v2641_v29  ;;  %v2648_v32 = vsel %vm1085_vm1, %v2644_v31, 0.0 }
 0xe74   : > { %v2645_v35 = vsel %vm1085_vm1, %v2643_v30, 0.0 }
 0xe75   : > { %2646 = vadd.xlane.f32.xlu0 %v2645_v35 }
 0xe79   : > { %2649 = vadd.xlane.f32.xlu0 %v2648_v32 }
 0xefe   : > { %v2647_v39 = vpop.xlane.xlu0 %2646 }
 0xeff   : > { %v2651_v42 = vmul.f32 0.03125, %v2647_v39 }
 0xf01   : > { %v2653_v44 = vadd.f32 1e-12, %v2651_v42 }
 0xf02   : > { %v2650_v36 = vpop.xlane.xlu0 %2649 }
 0xf03   : > { %3921 = vrsqrt.f32 %v2653_v44  ;;  %v2652_v46 = vmul.f32 0.03125, %v2650_v36 }
 0xf05   : > { %v2654_v47 = vadd.f32 1e-12, %v2652_v46 }
 0xf07   : > { %3923 = vrsqrt.f32 %v2654_v47 }
 0xf10   : > { %v3922_v48 = vpop.eup %3921 }
 0xf11   : > { %v2657_v49 = vmul.f32 %v3922_v48, %v2641_v29 }
 0xf13   : > { %v2665_v52 = vmul.f32 %v3464_v50, %v2657_v49 }
 0xf14   : > { %v3924_v40 = vpop.eup %3923 }
 0xf15   : > { %v2658_v53 = vmul.f32 %v3924_v40, %v2642_v28  ;;  %v5140_v54 = vadd.f32 %v3465_v51, %v2665_v52 }
 0xf17   : > { %v2666_v55 = vmul.f32 %v3464_v50, %v2658_v53  ;;  %3667 = vmatprep.mubr.msk.f32.mxu1 %vm1085_vm1, %v5140_v54  ;;  %v3473_v53 = vld [vmem:[%s5321_s4] ss:$0 sm:$0xff] }
 0xf19   : > { %v2674_v56 = vadd.f32 %v3465_v51, %v2666_v55  ;;  %v3472_v51 = vld [vmem:[%s5320_s6] ss:$0 sm:$0xff] }
 0xf1b   : > { %3668 = vmatmul.mubr.msk.f32.vlgmr.msra.gmra.mxu1 %vm1085_vm1, %v2674_v56 }
 0xfdb   : > { %v3669_v1 = vpop.f32.mrf.mxu1 }
 0xfdc   : > { %v2764_v2 = vadd.f32 %v3669_v1, %v3466_v0 }
 0xfdd   : > { %v2758_v3 = vpop.f32.mrf.mxu1 }
 0xfde   : > { %v2770_v4 = vmul.f32 0.044715, %v2764_v2  ;;  %v2759_v5 = vadd.f32 %v3466_v0, %v2758_v3  ;;  %v2768_v14 = vmul.f32 0.5, %v2764_v2 }
 0xfe0   : > { %v2772_v6 = vmul.f32 %v2770_v4, %v2764_v2  ;;  %v2769_v7 = vmul.f32 0.044715, %v2759_v5  ;;  %v2767_v19 = vmul.f32 0.5, %v2759_v5 }
 0xfe2   : > { %v2774_v8 = vmul.f32 %v2772_v6, %v2764_v2  ;;  %v2771_v9 = vmul.f32 %v2769_v7, %v2759_v5 }
 0xfe4   : > { %v2776_v10 = vadd.f32 %v2774_v8, %v2764_v2  ;;  %v2773_v11 = vmul.f32 %v2771_v9, %v2759_v5 }
 0xfe6   : > { %v2778_v12 = vmul.f32 0.7978846, %v2776_v10  ;;  %v2775_v13 = vadd.f32 %v2773_v11, %v2759_v5 }
 0xfe8   : > { %3925 = vtanh.f32 %v2778_v12  ;;  %v2777_v15 = vmul.f32 0.7978846, %v2775_v13 }
 0xfea   : > { %3927 = vtanh.f32 %v2777_v15 }
 0xff5   : > { %v3926_v45 = vpop.eup %3925 }
 0xff6   : > { %v2782_v18 = vadd.f32 1.0, %v3926_v45 }
 0xff7   : > { %v3928_v17 = vpop.eup %3927 }
 0xff8   : > { %v2781_v20 = vadd.f32 1.0, %v3928_v17  ;;  %v2784_v22 = vmul.f32 %v2782_v18, %v2768_v14 }
 0xffa   : > { %v2783_v21 = vmul.f32 %v2781_v20, %v2767_v19 }
 0xffc   : > { %3686 = vmatprep.mubr.msk.f32.mxu0 %vm2800_vm6, %v2783_v21 }
 0xffd   : > { %3687 = vmatmul.mubr.msk.f32.vlgmr.msra.gmra.mxu0 %vm2800_vm6, %v2784_v22 }
0x10bd   : > { %v3688_v24 = vpop.f32.mrf.mxu0 }
0x10be   : > { %v2879_v16 = vadd.f32 %v3688_v24, %v3469_v23 }
0x10bf   : > { %v2873_v25 = vpop.f32.mrf.mxu0 }
0x10c0   : > { %v2874_v43 = vadd.f32 %v3469_v23, %v2873_v25  ;;  %v2883_v26 = vadd.f32 %v2879_v16, %v2674_v56 }
0x10c2   : > { %v2889_v27 = vsel %vm1085_vm1, %v2883_v26, 0.0  ;;  %v2882_v28 = vadd.f32 %v2874_v43, %v5140_v54 }
0x10c3   : > { %2890 = vadd.xlane.f32.xlu0 %v2889_v27 }
0x10c4   : > { %v2886_v29 = vsel %vm1085_vm1, %v2882_v28, 0.0 }
0x10c5   : > { %2887 = vadd.xlane.f32.xlu1 %v2886_v29 }
0x114c   : > { %v2891_v30 = vpop.xlane.xlu0 %2890 }
0x114d   : > { %v2893_v35 = vmul.f32 0.03125, %v2891_v30 }
0x114e   : > { %v2888_v31 = vpop.xlane.xlu1 %2887 }
0x114f   : > { %v2895_v32 = vsub.f32 %v2883_v26, %v2893_v35  ;;  %v2892_v33 = vmul.f32 0.03125, %v2888_v31 }
0x1151   : > { %v2894_v34 = vsub.f32 %v2882_v28, %v2892_v33  ;;  %v2897_v37 = vmul.f32 %v2895_v32, %v2895_v32 }
0x1153   : > { %v2901_v38 = vsel %vm1085_vm1, %v2897_v37, 0.0  ;;  %v2896_v39 = vmul.f32 %v2894_v34, %v2894_v34 }
0x1154   : > { %2902 = vadd.xlane.f32.xlu0 %v2901_v38 }
0x1155   : > { %v2898_v42 = vsel %vm1085_vm1, %v2896_v39, 0.0 }
0x1156   : > { %2899 = vadd.xlane.f32.xlu1 %v2898_v42 }
0x11dd   : > { %v2903_v44 = vpop.xlane.xlu0 %2902 }
0x11de   : > { %v2905_v36 = vmul.f32 0.03125, %v2903_v44 }
0x11df   : > { %v2900_v46 = vpop.xlane.xlu1 %2899 }
0x11e0   : > { %v2907_v47 = vadd.f32 1e-12, %v2905_v36  ;;  %v2904_v48 = vmul.f32 0.03125, %v2900_v46 }
0x11e2   : > { %3929 = vrsqrt.f32 %v2907_v47  ;;  %v2906_v50 = vadd.f32 1e-12, %v2904_v48 }
0x11e4   : > { %3931 = vrsqrt.f32 %v2906_v50 }
0x11ef   : > { %v3930_v49 = vpop.eup %3929 }
0x11f0   : > { %v2911_v52 = vmul.f32 %v3930_v49, %v2895_v32 }
0x11f1   : > { %v3932_v40 = vpop.eup %3931 }
0x11f2   : > { %v2919_v54 = vmul.f32 %v3472_v51, %v2911_v52  ;;  %v2910_v55 = vmul.f32 %v3932_v40, %v2894_v34 }
0x11f4   : > { %v2927_v56 = vadd.f32 %v3473_v53, %v2919_v54  ;;  %v2918_v57 = vmul.f32 %v3472_v51, %v2910_v55  ;;  %2933 = sbr.rel (%p3474_p5) target bundleno = 5003 (0x138b), region = 168 }
0x11f6   : > { %2929 = vst.msk [vmem:[#allocation2 + $0x8] sm:$0xff] %vm1085_vm1, %v2927_v56  ;;  %v2926_v58 = vadd.f32 %v3473_v53, %v2918_v57 }
0x11f8   : > { %2928 = vst.msk [vmem:[#allocation2] sm:$0xff] %vm1085_vm1, %v2926_v58 }
0x11f9   : > { %v2937_v59 = vld [vmem:[#allocation19 + $0x18] sm:$0xff]  ;;  %v4462_v60 = vmov 0.0   ;;  %v2936_v61 = vld [vmem:[#allocation19 + $0x10] sm:$0xff]  ;;  %vm4463_vm7 = vmmov 0   ;;  %v3026_v62 = vld [vmem:[%s5322_s5 + $0x18] sm:$0xff]  ;;  %v2947_v63 = vrot.slane %v2927_v56, 7 }
0x11fa   : > { %3689 = vmatprep.subr.mxu0 %v4462_v60  ;;  %3697 = vmatprep.mubr.msk.f32.mxu0 %vm4463_vm7, %v4462_v60  ;;  %v2935_v41 = vld [vmem:[#allocation19 + $0x8] sm:$0xff]  ;;  %vm2948_vm8 = vcmask 1041409   ;;  %v2934_v0 = vld [vmem:[#allocation19] sm:$0xff]  ;;  %v3024_v3 = vld [vmem:[%s5322_s5 + $0x8] sm:$0xff] }
0x11fb   : > { %3690 = vmatpush3.msra.mxu0 %v2937_v59  ;;  %3700 = vmatprep.subr.mxu1 %v4462_v60  ;;  %v2949_v1 = vsel %vm2948_vm8, %v2947_v63, %v2926_v58  ;;  %v3025_v2 = vld [vmem:[%s5322_s5 + $0x10] sm:$0xff]  ;;  %v3023_v4 = vld [vmem:[%s5322_s5] sm:$0xff]  ;;  %v3477_v10 = vld [vmem:[#allocation21] ss:$0 sm:$0xff] }
0x11fc   : > { %3691 = vmatprep.subr.mxu0 %v4462_v60  ;;  %3701 = vmatpush3.msra.mxu1 %v3026_v62  ;;  %v3475_v5 = vld [vmem:[#allocation20] ss:$0 sm:$0xff] }
0x11fd   : > { %3692 = vmatpush3.msra.mxu0 %v2936_v61  ;;  %3702 = vmatprep.subr.mxu1 %v4462_v60 }
0x11fe   : > { %3693 = vmatprep.subr.mxu0 %v4462_v60  ;;  %3708 = vmatprep.mubr.msk.f32.mxu1 %vm4463_vm7, %v4462_v60 }
0x11ff   : > { %3694 = vmatpush3.msra.mxu0 %v2935_v41  ;;  %3703 = vmatpush3.msra.mxu1 %v3025_v2 }
0x1200   : > { %3695 = vmatprep.subr.mxu0 %v4462_v60  ;;  %3704 = vmatprep.subr.mxu1 %v4462_v60 }
0x1201   : > { %3696 = vmatpush3.msra.mxu0 %v2934_v0  ;;  %3705 = vmatpush3.msra.mxu1 %v3024_v3 }
0x1202   : > { %3698 = vmatmul.mubr.msk.f32.vlgmr.msra.gmra.mxu0 %vm1085_vm1, %v2949_v1  ;;  %3706 = vmatprep.subr.mxu1 %v4462_v60 }
0x1203   : > { %3707 = vmatpush3.msra.mxu1 %v3023_v4 }
0x12c2   : > { %v3018_v6 = vpop.f32.mrf.mxu0 }
0x12c3   : > { %v3019_v7 = vadd.f32 %v3475_v5, %v3018_v6 }
0x12c4   : > { %v3699_v8 = vpop.f32.mrf.mxu0 }
0x12c5   : > { %v3022_v9 = vmax.f32 %v3019_v7, 0.0 }
0x12c7   : > { %3709 = vmatmul.mubr.msk.f32.vlgmr.msra.gmra.mxu1 %vm1085_vm1, %v3022_v9 }
0x1387   : > { %v3103_v11 = vpop.f32.mrf.mxu1 }
0x1388   : > { %v3104_v12 = vadd.f32 %v3477_v10, %v3103_v11 }
0x1389   : > { %v3710_v13 = vpop.f32.mrf.mxu1 }
0x138a   : > { %3107 = vst [vmem:[#allocation23] sm:$0x3] %v3104_v12 }
0x138b PF: > { %p3821_p6 = scmp.eq.s32.totalorder %s4591_s3, 1  ;;  %s4464_s26 = smov [#allocation23]  }
0x138c   : > { %s3115_s25 = sshll.u32 %s4464_s26, 4  ;;  %s3116_s25 = int_to_ptr.vmem [resolvable:$true] %s3115_s25 }
0x138d   : > { %s4339_s22 = scalar_lea.vmem %s3116_s25, 32  ;;  %p4346_p7 = scmp.lt.s32.totalorder %s3116_s25, %s3116_s25 }
0x138e   : > { %p4340_p8 = scmp.ne.s32.totalorder %s3116_s25, %s4339_s22  ;;  %p4347_p11 = scmp.lt.s32.totalorder %s4339_s22, %s4339_s22 }
0x1390   : > { %p4341_p2 = pnand %p4340_p8, %p3821_p6  ;;  %p4348_p9 = por %p4347_p11, %p4346_p7 }
0x1392   : > { %p4342_p13 = pneg %p4341_p2 }
0x1394   : > { %p4349_p10 = pnand %p4348_p9, %p4342_p13 }
0x1396   : > { %4352 = shalt.err (!%p4349_p10)
}
0x1397   : > { %s5323_s12 = sld [smem:[#allocation49_spill]] }
0x139d   : > { %3756 = dma.vmem_to_hbm [thread:$0]  (%p3821_p6), %s3116_s25, 32, %s5323_s12, [#allocation5]  }
0x139e   : > { %4408 = dma.done.wait (%p3821_p6), [#allocation5], 32  }
0x139f   : > { %4410 = vsyncadd (%p3821_p6), [#allocation5], 4294967264 }
0x13a0 PF: > { %s5324_s24 = sld [smem:[#allocation35_spill]] }
0x13a1   : > { %s5325_s1 = sld [smem:[#allocation32_spill]] }
0x13a2   : > { %s5326_s22 = sld [smem:[#allocation33_spill]] }
0x13a3   : > { %s5327_s23 = sld [smem:[#allocation36_spill]] }
0x13a6   : > { %p32_p0 = scmp.ge.s32.totalorder %s5324_s24, 4  }
0x13a8   :  { %34 = sbr.rel (!%p32_p0) target bundleno = 19 (0x13), region = 261 }
0x13ad   :  { %3128 = vsyncpa [#allocation4], 1 }
0x13ae   :  { %3130 = vsyncpa [#allocation4 + $0x1], 1 }
0x13af   :  { %3131 = vsyncpa [#allocation7], 1 }
0x13b0   :  { %3132 = vsyncpa [#allocation10], 1 }
0x13b1   :  { %3133 = vsyncpa [#allocation22], 1 }
0x13b2   :  { %3134 = vsyncpa [#allocation5], 1 }
0x13b3   :  { %3136 = vsyncpa [#allocation5 + $0x1], 1 }

</bundles_post_ra>
